<compile_context>
chip_gen: v6e
topology: v6e:2x2x1
jax: 0.10.0
libtpu: 0.0.40
codegen_flags: <defaults>
</compile_context>

<pallas_src>
import functools

import jax
import jax.numpy as jnp
from jax.experimental import pallas as pl
from jax.experimental.pallas import tpu as pltpu


BN_EPS = 1e-5
_LANES = 128


def _round_up(x, m):
    return ((x + m - 1) // m) * m


def _conv_bn_kernel(x_ref, w_ref, bias_ref, o_ref, acc_ref, *,
                    kh, kw, stride, dilation, ho, wo):
    """One batch element: direct conv as KH*KW shifted matmuls + folded-BN bias.

    x_ref   : (1, Hp, Wp, Cin)   bf16, spatially pre-padded NHWC input
    w_ref   : (KH*KW, Cin, Cp)   bf16, BN scale folded, Cout zero-padded to lane width
    bias_ref: (1, Cp)            f32, folded BN bias
    o_ref   : (1, Ho*Wo, Cp)     f32 output block (lane-dense)
    acc_ref : (Ho*Wo, Cp)        f32 VMEM accumulator scratch
    """
    xt = x_ref[0]                                   # (Hp, Wp, Cin) bf16
    cin = xt.shape[-1]
    for tap in range(kh * kw):
        i, j = tap // kw, tap % kw
        hs, ws = i * dilation, j * dilation
        sl = jax.lax.slice(
            xt,
            (hs, ws, 0),
            (hs + (ho - 1) * stride + 1, ws + (wo - 1) * stride + 1, cin),
            (stride, stride, 1))                    # (Ho, Wo, Cin)
        lhs = sl.reshape(ho * wo, cin)              # (M, Cin) bf16
        p = jnp.dot(lhs, w_ref[tap], preferred_element_type=jnp.float32)
        if tap == 0:
            acc_ref[...] = p
        else:
            acc_ref[...] += p
    # f32 epilogue (v5e has no bf16 VPU path); single folded-BN bias add.
    o_ref[0] = (acc_ref[...] + bias_ref[...]).astype(o_ref.dtype)


@functools.partial(jax.jit,
                   static_argnames=("kernel_size", "stride", "padding", "dilation"))
def basic_conv2d(x_nchw, conv_w, gamma, beta, run_mean, run_var,
                 *, kernel_size, stride=1, padding=0, dilation=1):
    """Forward of BasicConv2d: bn(conv(x)), no ReLU. (N,Cin,H,W) -> (N,Cout,Ho,Wo)."""
    n, cin, h, w = x_nchw.shape
    cout = conv_w.shape[0]
    kh = kw = kernel_size
    ho = (h + 2 * padding - dilation * (kh - 1) - 1) // stride + 1
    wo = (w + 2 * padding - dilation * (kw - 1) - 1) // stride + 1
    cp = _round_up(cout, _LANES)                    # lane-dense output channels

    # --- glue: O(weights)+O(input) work only, no K^2 blowup --------------------------
    # Eval-mode BN folded into a per-output-channel scale and bias.
    scale = gamma * jax.lax.rsqrt(run_var + BN_EPS)                 # (Cout,)
    bias = beta - run_mean * scale                                  # (Cout,)

    # PyTorch weight (Cout, Cin, KH, KW) -> (KH*KW, Cin, Cout_pad), scale folded, bf16.
    w_mat = jnp.transpose(conv_w, (2, 3, 1, 0)) * scale             # (KH, KW, Cin, Cout)
    w_mat = w_mat.reshape(kh * kw, cin, cout)
    w_mat = jnp.pad(w_mat, ((0, 0), (0, 0), (0, cp - cout))).astype(jnp.bfloat16)
    bias_row = jnp.pad(bias, (0, cp - cout)).reshape(1, cp).astype(jnp.float32)

    # NCHW -> NHWC, spatial zero pad (the conv padding), bf16 MXU operand.
    x_nhwc = jnp.transpose(x_nchw, (0, 2, 3, 1))
    x_pad = jnp.pad(x_nhwc, ((0, 0), (padding, padding), (padding, padding), (0, 0)))
    x_pad = x_pad.astype(jnp.bfloat16)
    hp, wp = x_pad.shape[1], x_pad.shape[2]

    kernel = functools.partial(_conv_bn_kernel, kh=kh, kw=kw, stride=stride,
                               dilation=dilation, ho=ho, wo=wo)

    out = pl.pallas_call(
        kernel,
        out_shape=jax.ShapeDtypeStruct((n, ho * wo, cp), jnp.float32),
        grid_spec=pltpu.PrefetchScalarGridSpec(
            num_scalar_prefetch=0,
            grid=(n,),
            in_specs=[
                pl.BlockSpec((1, hp, wp, cin), lambda b: (b, 0, 0, 0)),
                pl.BlockSpec((kh * kw, cin, cp), lambda b: (0, 0, 0)),
                pl.BlockSpec((1, cp), lambda b: (0, 0)),
            ],
            out_specs=pl.BlockSpec((1, ho * wo, cp), lambda b: (b, 0, 0)),
            scratch_shapes=[pltpu.VMEM((ho * wo, cp), jnp.float32)],
        ),
        compiler_params=pltpu.CompilerParams(dimension_semantics=("parallel",)),
    )(x_pad, w_mat, bias_row)

    out = out[:, :, :cout].reshape(n, ho, wo, cout)
    return jnp.transpose(out, (0, 3, 1, 2)).astype(x_nchw.dtype)   # back to NCHW


if __name__ == "__main__":
    # BasicConv2d(in_planes=4, out_planes=8, kernel_size=3, stride=1, padding=1)
    in_planes, out_planes, ksize, stride, padding, dilation = 4, 8, 3, 1, 1, 1
    key = jax.random.PRNGKey(0)
    kx, kwt = jax.random.split(key)

    x = jax.random.normal(kx, (2, in_planes, 16, 16), dtype=jnp.float32)          # NCHW
    conv_w = 0.1 * jax.random.normal(kwt, (out_planes, in_planes, ksize, ksize),
                                     dtype=jnp.float32)                           # OIHW
    gamma = jnp.ones((out_planes,), jnp.float32)      # BN weight init
    beta = jnp.zeros((out_planes,), jnp.float32)      # BN bias init
    run_mean = jnp.zeros((out_planes,), jnp.float32)  # running_mean init
    run_var = jnp.ones((out_planes,), jnp.float32)    # running_var init

    y = basic_conv2d(x, conv_w, gamma, beta, run_mean, run_var,
                     kernel_size=ksize, stride=stride, padding=padding,
                     dilation=dilation)
    y = jax.block_until_ready(y)
    assert y.shape == (2, out_planes, 16, 16)

    # --- tight check: XLA conv on the SAME bf16-rounded folded operands --------------
    scale = gamma * jax.lax.rsqrt(run_var + BN_EPS)
    bias = beta - run_mean * scale
    w_folded = (conv_w * scale[:, None, None, None]).astype(jnp.bfloat16).astype(jnp.float32)
    x_b = x.astype(jnp.bfloat16).astype(jnp.float32)
    ref_tight = jax.lax.conv_general_dilated(
        x_b, w_folded, window_strides=(stride, stride),
        padding=[(padding, padding), (padding, padding)],
        rhs_dilation=(dilation, dilation),
        dimension_numbers=("NCHW", "OIHW", "NCHW")) + bias[None, :, None, None]
    assert jnp.max(jnp.abs(y - ref_tight)) < 1e-3

    # --- semantic check: full-f32 conv + eval-mode BN (tolerance for bf16 operands) --
    ref = jax.lax.conv_general_dilated(
        x, conv_w, window_strides=(stride, stride),
        padding=[(padding, padding), (padding, padding)],
        rhs_dilation=(dilation, dilation),
        dimension_numbers=("NCHW", "OIHW", "NCHW"))
    ref = (ref - run_mean[None, :, None, None]) * jax.lax.rsqrt(
        run_var[None, :, None, None] + BN_EPS)
    ref = ref * gamma[None, :, None, None] + beta[None, :, None, None]
    assert jnp.max(jnp.abs(y - ref)) < 5e-2

    print("KERNEL_OK")
</pallas_src>

<mosaic_0001>
module attributes {stable_mosaic.version = 11 : i64} {
  func.func @_conv_bn_kernel(%arg0: i32, %arg1: memref<1x18x18x4xbf16, #tpu.memory_space<vmem>>, %arg2: memref<9x4x128xbf16, #tpu.memory_space<vmem>>, %arg3: memref<1x128xf32, #tpu.memory_space<vmem>>, %arg4: memref<1x256x128xf32, #tpu.memory_space<vmem>>, %arg5: memref<256x128xf32, #tpu.memory_space<vmem>>) attributes {dimension_semantics = [#tpu.dimension_semantics<parallel>], iteration_bounds = array<i64: 2>, scalar_prefetch = 0 : i64, scratch_operands = 1 : i64, tpu.core_type = #tpu.core_type<tc>, window_params = [{transform_indices = @transform_0, window_bounds = array<i64: 1, 18, 18, 4>}, {pipeline_mode = #tpu.pipeline_mode<synchronous>, transform_indices = @transform_1, window_bounds = array<i64: 9, 4, 128>}, {pipeline_mode = #tpu.pipeline_mode<synchronous>, transform_indices = @transform_2, window_bounds = array<i64: 1, 128>}, {transform_indices = @transform_3, window_bounds = array<i64: 1, 256, 128>}]} {
    %c0 = arith.constant 0 : index
    %c0_0 = arith.constant 0 : index
    %c0_1 = arith.constant 0 : index
    %c0_2 = arith.constant 0 : index
    %0 = vector.load %arg1[%c0, %c0_0, %c0_1, %c0_2] : memref<1x18x18x4xbf16, #tpu.memory_space<vmem>>, vector<1x18x18x4xbf16>
    %1 = vector.shape_cast %0 : vector<1x18x18x4xbf16> to vector<18x18x4xbf16>
    %2 = vector.extract_strided_slice %1 {offsets = [0, 0, 0], sizes = [16, 16, 4], strides = [1, 1, 1]} : vector<18x18x4xbf16> to vector<16x16x4xbf16>
    %3 = vector.shape_cast %2 : vector<16x16x4xbf16> to vector<256x4xbf16>
    %c0_3 = arith.constant 0 : index
    %c0_4 = arith.constant 0 : index
    %c0_5 = arith.constant 0 : index
    %4 = vector.load %arg2[%c0_3, %c0_4, %c0_5] : memref<9x4x128xbf16, #tpu.memory_space<vmem>>, vector<1x4x128xbf16>
    %5 = vector.shape_cast %4 : vector<1x4x128xbf16> to vector<4x128xbf16>
    %cst = arith.constant dense<0.000000e+00> : vector<256x128xf32>
    %6 = tpu.matmul %3, %5, %cst {dimension_numbers = #tpu.dot_dimension_numbers<[1], [0], [0], [1], [0, 0, 1, 1], [], []>} : vector<256x4xbf16>, vector<4x128xbf16>, vector<256x128xf32> -> vector<256x128xf32>
    %c0_6 = arith.constant 0 : index
    %c0_7 = arith.constant 0 : index
    %7 = vector.load %arg5[%c0_6, %c0_7] : memref<256x128xf32, #tpu.memory_space<vmem>>, vector<256x128xf32>
    tpu.vector_store %arg5[%c0_6, %c0_7], %6 {strides = array<i32>} : memref<256x128xf32, #tpu.memory_space<vmem>>, vector<256x128xf32>,
    %8 = vector.extract_strided_slice %1 {offsets = [0, 1, 0], sizes = [16, 16, 4], strides = [1, 1, 1]} : vector<18x18x4xbf16> to vector<16x16x4xbf16>
    %9 = vector.shape_cast %8 : vector<16x16x4xbf16> to vector<256x4xbf16>
    %c1 = arith.constant 1 : index
    %c0_8 = arith.constant 0 : index
    %c0_9 = arith.constant 0 : index
    %10 = vector.load %arg2[%c1, %c0_8, %c0_9] : memref<9x4x128xbf16, #tpu.memory_space<vmem>>, vector<1x4x128xbf16>
    %11 = vector.shape_cast %10 : vector<1x4x128xbf16> to vector<4x128xbf16>
    %cst_10 = arith.constant dense<0.000000e+00> : vector<256x128xf32>
    %12 = tpu.matmul %9, %11, %cst_10 {dimension_numbers = #tpu.dot_dimension_numbers<[1], [0], [0], [1], [0, 0, 1, 1], [], []>} : vector<256x4xbf16>, vector<4x128xbf16>, vector<256x128xf32> -> vector<256x128xf32>
    %c0_11 = arith.constant 0 : index
    %c0_12 = arith.constant 0 : index
    %13 = vector.load %arg5[%c0_11, %c0_12] : memref<256x128xf32, #tpu.memory_space<vmem>>, vector<256x128xf32>
    %14 = arith.addf %13, %12 : vector<256x128xf32>
    %c0_13 = arith.constant 0 : index
    %c0_14 = arith.constant 0 : index
    %15 = vector.load %arg5[%c0_13, %c0_14] : memref<256x128xf32, #tpu.memory_space<vmem>>, vector<256x128xf32>
    tpu.vector_store %arg5[%c0_13, %c0_14], %14 {strides = array<i32>} : memref<256x128xf32, #tpu.memory_space<vmem>>, vector<256x128xf32>,
    %16 = vector.extract_strided_slice %1 {offsets = [0, 2, 0], sizes = [16, 16, 4], strides = [1, 1, 1]} : vector<18x18x4xbf16> to vector<16x16x4xbf16>
    %17 = vector.shape_cast %16 : vector<16x16x4xbf16> to vector<256x4xbf16>
    %c2 = arith.constant 2 : index
    %c0_15 = arith.constant 0 : index
    %c0_16 = arith.constant 0 : index
    %18 = vector.load %arg2[%c2, %c0_15, %c0_16] : memref<9x4x128xbf16, #tpu.memory_space<vmem>>, vector<1x4x128xbf16>
    %19 = vector.shape_cast %18 : vector<1x4x128xbf16> to vector<4x128xbf16>
    %cst_17 = arith.constant dense<0.000000e+00> : vector<256x128xf32>
    %20 = tpu.matmul %17, %19, %cst_17 {dimension_numbers = #tpu.dot_dimension_numbers<[1], [0], [0], [1], [0, 0, 1, 1], [], []>} : vector<256x4xbf16>, vector<4x128xbf16>, vector<256x128xf32> -> vector<256x128xf32>
    %c0_18 = arith.constant 0 : index
    %c0_19 = arith.constant 0 : index
    %21 = vector.load %arg5[%c0_18, %c0_19] : memref<256x128xf32, #tpu.memory_space<vmem>>, vector<256x128xf32>
    %22 = arith.addf %21, %20 : vector<256x128xf32>
    %c0_20 = arith.constant 0 : index
    %c0_21 = arith.constant 0 : index
    %23 = vector.load %arg5[%c0_20, %c0_21] : memref<256x128xf32, #tpu.memory_space<vmem>>, vector<256x128xf32>
    tpu.vector_store %arg5[%c0_20, %c0_21], %22 {strides = array<i32>} : memref<256x128xf32, #tpu.memory_space<vmem>>, vector<256x128xf32>,
    %24 = vector.extract_strided_slice %1 {offsets = [1, 0, 0], sizes = [16, 16, 4], strides = [1, 1, 1]} : vector<18x18x4xbf16> to vector<16x16x4xbf16>
    %25 = vector.shape_cast %24 : vector<16x16x4xbf16> to vector<256x4xbf16>
    %c3 = arith.constant 3 : index
    %c0_22 = arith.constant 0 : index
    %c0_23 = arith.constant 0 : index
    %26 = vector.load %arg2[%c3, %c0_22, %c0_23] : memref<9x4x128xbf16, #tpu.memory_space<vmem>>, vector<1x4x128xbf16>
    %27 = vector.shape_cast %26 : vector<1x4x128xbf16> to vector<4x128xbf16>
    %cst_24 = arith.constant dense<0.000000e+00> : vector<256x128xf32>
    %28 = tpu.matmul %25, %27, %cst_24 {dimension_numbers = #tpu.dot_dimension_numbers<[1], [0], [0], [1], [0, 0, 1, 1], [], []>} : vector<256x4xbf16>, vector<4x128xbf16>, vector<256x128xf32> -> vector<256x128xf32>
    %c0_25 = arith.constant 0 : index
    %c0_26 = arith.constant 0 : index
    %29 = vector.load %arg5[%c0_25, %c0_26] : memref<256x128xf32, #tpu.memory_space<vmem>>, vector<256x128xf32>
    %30 = arith.addf %29, %28 : vector<256x128xf32>
    %c0_27 = arith.constant 0 : index
    %c0_28 = arith.constant 0 : index
    %31 = vector.load %arg5[%c0_27, %c0_28] : memref<256x128xf32, #tpu.memory_space<vmem>>, vector<256x128xf32>
    tpu.vector_store %arg5[%c0_27, %c0_28], %30 {strides = array<i32>} : memref<256x128xf32, #tpu.memory_space<vmem>>, vector<256x128xf32>,
    %32 = vector.extract_strided_slice %1 {offsets = [1, 1, 0], sizes = [16, 16, 4], strides = [1, 1, 1]} : vector<18x18x4xbf16> to vector<16x16x4xbf16>
    %33 = vector.shape_cast %32 : vector<16x16x4xbf16> to vector<256x4xbf16>
    %c4 = arith.constant 4 : index
    %c0_29 = arith.constant 0 : index
    %c0_30 = arith.constant 0 : index
    %34 = vector.load %arg2[%c4, %c0_29, %c0_30] : memref<9x4x128xbf16, #tpu.memory_space<vmem>>, vector<1x4x128xbf16>
    %35 = vector.shape_cast %34 : vector<1x4x128xbf16> to vector<4x128xbf16>
    %cst_31 = arith.constant dense<0.000000e+00> : vector<256x128xf32>
    %36 = tpu.matmul %33, %35, %cst_31 {dimension_numbers = #tpu.dot_dimension_numbers<[1], [0], [0], [1], [0, 0, 1, 1], [], []>} : vector<256x4xbf16>, vector<4x128xbf16>, vector<256x128xf32> -> vector<256x128xf32>
    %c0_32 = arith.constant 0 : index
    %c0_33 = arith.constant 0 : index
    %37 = vector.load %arg5[%c0_32, %c0_33] : memref<256x128xf32, #tpu.memory_space<vmem>>, vector<256x128xf32>
    %38 = arith.addf %37, %36 : vector<256x128xf32>
    %c0_34 = arith.constant 0 : index
    %c0_35 = arith.constant 0 : index
    %39 = vector.load %arg5[%c0_34, %c0_35] : memref<256x128xf32, #tpu.memory_space<vmem>>, vector<256x128xf32>
    tpu.vector_store %arg5[%c0_34, %c0_35], %38 {strides = array<i32>} : memref<256x128xf32, #tpu.memory_space<vmem>>, vector<256x128xf32>,
    %40 = vector.extract_strided_slice %1 {offsets = [1, 2, 0], sizes = [16, 16, 4], strides = [1, 1, 1]} : vector<18x18x4xbf16> to vector<16x16x4xbf16>
    %41 = vector.shape_cast %40 : vector<16x16x4xbf16> to vector<256x4xbf16>
    %c5 = arith.constant 5 : index
    %c0_36 = arith.constant 0 : index
    %c0_37 = arith.constant 0 : index
    %42 = vector.load %arg2[%c5, %c0_36, %c0_37] : memref<9x4x128xbf16, #tpu.memory_space<vmem>>, vector<1x4x128xbf16>
    %43 = vector.shape_cast %42 : vector<1x4x128xbf16> to vector<4x128xbf16>
    %cst_38 = arith.constant dense<0.000000e+00> : vector<256x128xf32>
    %44 = tpu.matmul %41, %43, %cst_38 {dimension_numbers = #tpu.dot_dimension_numbers<[1], [0], [0], [1], [0, 0, 1, 1], [], []>} : vector<256x4xbf16>, vector<4x128xbf16>, vector<256x128xf32> -> vector<256x128xf32>
    %c0_39 = arith.constant 0 : index
    %c0_40 = arith.constant 0 : index
    %45 = vector.load %arg5[%c0_39, %c0_40] : memref<256x128xf32, #tpu.memory_space<vmem>>, vector<256x128xf32>
    %46 = arith.addf %45, %44 : vector<256x128xf32>
    %c0_41 = arith.constant 0 : index
    %c0_42 = arith.constant 0 : index
    %47 = vector.load %arg5[%c0_41, %c0_42] : memref<256x128xf32, #tpu.memory_space<vmem>>, vector<256x128xf32>
    tpu.vector_store %arg5[%c0_41, %c0_42], %46 {strides = array<i32>} : memref<256x128xf32, #tpu.memory_space<vmem>>, vector<256x128xf32>,
    %48 = vector.extract_strided_slice %1 {offsets = [2, 0, 0], sizes = [16, 16, 4], strides = [1, 1, 1]} : vector<18x18x4xbf16> to vector<16x16x4xbf16>
    %49 = vector.shape_cast %48 : vector<16x16x4xbf16> to vector<256x4xbf16>
    %c6 = arith.constant 6 : index
    %c0_43 = arith.constant 0 : index
    %c0_44 = arith.constant 0 : index
    %50 = vector.load %arg2[%c6, %c0_43, %c0_44] : memref<9x4x128xbf16, #tpu.memory_space<vmem>>, vector<1x4x128xbf16>
    %51 = vector.shape_cast %50 : vector<1x4x128xbf16> to vector<4x128xbf16>
    %cst_45 = arith.constant dense<0.000000e+00> : vector<256x128xf32>
    %52 = tpu.matmul %49, %51, %cst_45 {dimension_numbers = #tpu.dot_dimension_numbers<[1], [0], [0], [1], [0, 0, 1, 1], [], []>} : vector<256x4xbf16>, vector<4x128xbf16>, vector<256x128xf32> -> vector<256x128xf32>
    %c0_46 = arith.constant 0 : index
    %c0_47 = arith.constant 0 : index
    %53 = vector.load %arg5[%c0_46, %c0_47] : memref<256x128xf32, #tpu.memory_space<vmem>>, vector<256x128xf32>
    %54 = arith.addf %53, %52 : vector<256x128xf32>
    %c0_48 = arith.constant 0 : index
    %c0_49 = arith.constant 0 : index
    %55 = vector.load %arg5[%c0_48, %c0_49] : memref<256x128xf32, #tpu.memory_space<vmem>>, vector<256x128xf32>
    tpu.vector_store %arg5[%c0_48, %c0_49], %54 {strides = array<i32>} : memref<256x128xf32, #tpu.memory_space<vmem>>, vector<256x128xf32>,
    %56 = vector.extract_strided_slice %1 {offsets = [2, 1, 0], sizes = [16, 16, 4], strides = [1, 1, 1]} : vector<18x18x4xbf16> to vector<16x16x4xbf16>
    %57 = vector.shape_cast %56 : vector<16x16x4xbf16> to vector<256x4xbf16>
    %c7 = arith.constant 7 : index
    %c0_50 = arith.constant 0 : index
    %c0_51 = arith.constant 0 : index
    %58 = vector.load %arg2[%c7, %c0_50, %c0_51] : memref<9x4x128xbf16, #tpu.memory_space<vmem>>, vector<1x4x128xbf16>
    %59 = vector.shape_cast %58 : vector<1x4x128xbf16> to vector<4x128xbf16>
    %cst_52 = arith.constant dense<0.000000e+00> : vector<256x128xf32>
    %60 = tpu.matmul %57, %59, %cst_52 {dimension_numbers = #tpu.dot_dimension_numbers<[1], [0], [0], [1], [0, 0, 1, 1], [], []>} : vector<256x4xbf16>, vector<4x128xbf16>, vector<256x128xf32> -> vector<256x128xf32>
    %c0_53 = arith.constant 0 : index
    %c0_54 = arith.constant 0 : index
    %61 = vector.load %arg5[%c0_53, %c0_54] : memref<256x128xf32, #tpu.memory_space<vmem>>, vector<256x128xf32>
    %62 = arith.addf %61, %60 : vector<256x128xf32>
    %c0_55 = arith.constant 0 : index
    %c0_56 = arith.constant 0 : index
    %63 = vector.load %arg5[%c0_55, %c0_56] : memref<256x128xf32, #tpu.memory_space<vmem>>, vector<256x128xf32>
    tpu.vector_store %arg5[%c0_55, %c0_56], %62 {strides = array<i32>} : memref<256x128xf32, #tpu.memory_space<vmem>>, vector<256x128xf32>,
    %64 = vector.extract_strided_slice %1 {offsets = [2, 2, 0], sizes = [16, 16, 4], strides = [1, 1, 1]} : vector<18x18x4xbf16> to vector<16x16x4xbf16>
    %65 = vector.shape_cast %64 : vector<16x16x4xbf16> to vector<256x4xbf16>
    %c8 = arith.constant 8 : index
    %c0_57 = arith.constant 0 : index
    %c0_58 = arith.constant 0 : index
    %66 = vector.load %arg2[%c8, %c0_57, %c0_58] : memref<9x4x128xbf16, #tpu.memory_space<vmem>>, vector<1x4x128xbf16>
    %67 = vector.shape_cast %66 : vector<1x4x128xbf16> to vector<4x128xbf16>
    %cst_59 = arith.constant dense<0.000000e+00> : vector<256x128xf32>
    %68 = tpu.matmul %65, %67, %cst_59 {dimension_numbers = #tpu.dot_dimension_numbers<[1], [0], [0], [1], [0, 0, 1, 1], [], []>} : vector<256x4xbf16>, vector<4x128xbf16>, vector<256x128xf32> -> vector<256x128xf32>
    %c0_60 = arith.constant 0 : index
    %c0_61 = arith.constant 0 : index
    %69 = vector.load %arg5[%c0_60, %c0_61] : memref<256x128xf32, #tpu.memory_space<vmem>>, vector<256x128xf32>
    %70 = arith.addf %69, %68 : vector<256x128xf32>
    %c0_62 = arith.constant 0 : index
    %c0_63 = arith.constant 0 : index
    %71 = vector.load %arg5[%c0_62, %c0_63] : memref<256x128xf32, #tpu.memory_space<vmem>>, vector<256x128xf32>
    tpu.vector_store %arg5[%c0_62, %c0_63], %70 {strides = array<i32>} : memref<256x128xf32, #tpu.memory_space<vmem>>, vector<256x128xf32>,
    %c0_64 = arith.constant 0 : index
    %c0_65 = arith.constant 0 : index
    %72 = vector.load %arg5[%c0_64, %c0_65] : memref<256x128xf32, #tpu.memory_space<vmem>>, vector<256x128xf32>
    %c0_66 = arith.constant 0 : index
    %c0_67 = arith.constant 0 : index
    %73 = vector.load %arg3[%c0_66, %c0_67] : memref<1x128xf32, #tpu.memory_space<vmem>>, vector<1x128xf32>
    %74 = vector.broadcast %73 : vector<1x128xf32> to vector<256x128xf32>
    %75 = arith.addf %72, %74 : vector<256x128xf32>
    %c0_68 = arith.constant 0 : index
    %c0_69 = arith.constant 0 : index
    %c0_70 = arith.constant 0 : index
    %76 = vector.load %arg4[%c0_68, %c0_69, %c0_70] : memref<1x256x128xf32, #tpu.memory_space<vmem>>, vector<1x256x128xf32>
    %77 = vector.shape_cast %76 : vector<1x256x128xf32> to vector<256x128xf32>
    %78 = vector.shape_cast %75 : vector<256x128xf32> to vector<1x256x128xf32>
    tpu.vector_store %arg4[%c0_68, %c0_69, %c0_70], %78 {strides = array<i32>} : memref<1x256x128xf32, #tpu.memory_space<vmem>>, vector<1x256x128xf32>,
    return
  }
  func.func @transform_0(%arg0: i32) -> (i32, i32, i32, i32) {
    %c0_i32 = arith.constant 0 : i32
    %c0_i32_0 = arith.constant 0 : i32
    %c0_i32_1 = arith.constant 0 : i32
    %c0_i32_2 = arith.constant 0 : i32
    return %arg0, %c0_i32, %c0_i32_0, %c0_i32_1 : i32, i32, i32, i32
  }
  func.func @transform_1(%arg0: i32) -> (i32, i32, i32) {
    %c0_i32 = arith.constant 0 : i32
    %c0_i32_0 = arith.constant 0 : i32
    %c0_i32_1 = arith.constant 0 : i32
    %c0_i32_2 = arith.constant 0 : i32
    return %c0_i32, %c0_i32_0, %c0_i32_1 : i32, i32, i32
  }
  func.func @transform_2(%arg0: i32) -> (i32, i32) {
    %c0_i32 = arith.constant 0 : i32
    %c0_i32_0 = arith.constant 0 : i32
    %c0_i32_1 = arith.constant 0 : i32
    return %c0_i32, %c0_i32_0 : i32, i32
  }
  func.func @transform_3(%arg0: i32) -> (i32, i32, i32) {
    %c0_i32 = arith.constant 0 : i32
    %c0_i32_0 = arith.constant 0 : i32
    %c0_i32_1 = arith.constant 0 : i32
    return %arg0, %c0_i32, %c0_i32_0 : i32, i32, i32
  }
}

</mosaic_0001>

<bundles_post_ra>
// kernel: basic_conv2d.1
= control target key start
LH: loop header
LB: loop body
LE: loop exit
PB: predicated region body
PF: predicated region fallthrough
CT: control target
= control target key end

     0   :  { %s4383_s12 = smov 0   ;;  %s5954_s0 = inlined_call_operand.vmem [shape: bf16[2,18,18,4], index: 0, kind: input, shape index: {}]   ;;  %s5955_s1 = inlined_call_operand.vmem [shape: bf16[9,4,128], index: 1, kind: input, shape index: {}]   ;;  %s5956_s2 = inlined_call_operand.vmem [shape: f32[1,128], index: 2, kind: input, shape index: {}]   ;;  %s5957_s3 = inlined_call_operand.vmem [shape: f32[2,256,128], index: 3, kind: output, shape index: {}]  }
   0x1 LB: > { %s3621_s13 = sadd.s32 4294967295, %s4361_s12   ;;  %p3625_p0 = scmp.ge.s32.totalorder %s4361_s12, 1  ;;  %s4361_s12 = sphi %s4383_s12, %s13_s12  }
   0x2   : > { %p137_p1 = scmp.lt.s32.totalorder %s4361_s12, 3 }
   0x4   : > { %p138_p2 = pnand %p3625_p0, %p137_p1 }
   0x6   : > { %141 = sbr.rel (%p138_p2) target bundleno = 526 (0x20e), region = 32 }
   0xb   : > { %v226_v0 = vld [vmem:[%s5955_s1] sm:$0x3]  ;;  %vm356_vm0 = vcmask 1041408   ;;  %p161_p3 = scmp.lt.s32.totalorder %s3621_s13, 1  ;;  %v3661_v2 = vld [vmem:[%s5955_s1 + $0x2] sm:$0x3] }
   0xc   : > { %4319 = vmatprep.subr.msk.bf16.mxu1 %vm356_vm0, %v226_v0  ;;  %4318 = vmatprep.subr.msk.bf16.mxu0 %vm356_vm0, %v226_v0  ;;  %v358_v1 = vsel %vm356_vm0, %v226_v0, 0  ;;  %v3710_v3 = vld [vmem:[%s5955_s1 + $0x4] sm:$0x3]  ;;  %v4410_v4 = vld [vmem:[%s5955_s1 + $0x6] sm:$0x3]  ;;  %vm307_vm1 = vcmask 31744  }
   0xd   : > { %4317 = vmatpush3.bf16.msra.mxu1 %v358_v1  ;;  %4011 = vmatpush3.bf16.msra.mxu0 %v358_v1  ;;  %s6174_s13 = smov (!%p161_p3, %s3621_s13), 1  ;;  %v4415_v5 = vld [vmem:[%s5955_s1 + $0x8] sm:$0x3]  ;;  %v4424_v6 = vsel %vm356_vm0, %v3661_v2, 0  ;;  %v1528_v7 = vsel %vm356_vm0, %v3710_v3, 0  ;;  %v4429_v8 = vsel %vm356_vm0, %v4410_v4, 0 }
   0xe   : > { %4320 = vmatprep.subr.msk.bf16.mxu1 %vm356_vm0, %v3661_v2  ;;  %4321 = vmatprep.subr.msk.bf16.mxu0 %vm356_vm0, %v3710_v3  ;;  %s4328_s24 = smul.u32 216, %s6174_s13  ;;  %v4433_v9 = vsel %vm356_vm0, %v4415_v5, 0  ;;  %vm553_vm2 = vsmask.f32 3328  ;;  %vm554_vm3 = vsmask.f32 7440 }
   0xf   : > { %vm1314_vm4 = vcmask 1042432   ;;  %vm1315_vm5 = vcmask 1046532   ;;  %vm4610_vm6 = vmor %vm553_vm2, %vm554_vm3  ;;  %v6004_v41 = vmov 0  ;;  %s3856_s9 = sshll.u32 %s6174_s13, 8 }
  0x10   : > { %s4421_s27 = scalar_lea.vmem %s5954_s0, %s4328_s24  ;;  %vm4637_vm7 = vmor %vm1314_vm4, %vm1315_vm5  ;;  %s5804_s15 = scalar_lea.vmem %s5957_s3, %s3856_s9 }
  0x11   : > { %v4436_v10 = vld [vmem:[%s4421_s27] sm:$0xf]  ;;  %v4439_v11 = vld [vmem:[%s4421_s27 + $0x4] sm:$0xf]  ;;  %v4460_v22 = vld [vmem:[%s4421_s27 + $0xc] sm:$0xf] }
  0x12   : > { %v4442_v12 = vld [vmem:[%s4421_s27 + $0x60] sm:$0xf]  ;;  %v3629_v13 = vcombine.low %v4436_v10, %v4439_v11  ;;  %v557_v14 = vshrl.u32 %v4436_v10, 16  ;;  %v560_v15 = vshll.u32 %v4436_v10, 16  ;;  %v566_v16 = vshll.u32 %v4439_v11, 16 }
  0x13   : > { %v4450_v17 = vld [vmem:[%s4421_s27 + $0x64] sm:$0xf]  ;;  %v570_v18 = vshrl.u32 %v4439_v11, 16  ;;  %v3694_v19 = vrot.slane %v4436_v10, 9  ;;  %v1319_v20 = vrot.slane %v4439_v11, 5  ;;  %v749_v26 = vshrl.u32 %v4442_v12, 16 }
  0x14   : > { %v4457_v21 = vcombine.low %v4442_v12, %v4450_v17  ;;  %4012 = vmatprep.mubr.msk.bf16.mxu0 %vm307_vm1, %v3629_v13  ;;  %v559_v23 = vrot.slane %v557_v14, 4  ;;  %v562_v24 = vrot.slane %v560_v15, 5  ;;  %v4463_v25 = vrot.slane %v566_v16, 5  ;;  %v4467_v27 = vld [vmem:[%s4421_s27 + $0x10] sm:$0xf] }
  0x15   : > { %v572_v28 = vrot.slane %v570_v18, 4  ;;  %v4471_v29 = vrot.slane %v1319_v20, 4  ;;  %v752_v30 = vshll.u32 %v4442_v12, 16  ;;  %v758_v31 = vshll.u32 %v4450_v17, 16  ;;  %v4478_v32 = vld [vmem:[%s4421_s27 + $0x6c] sm:$0xf] }
  0x16   : > { %5992 = vst [vmem:[#allocation3_spill] sm:$0xff] %v4457_v21  ;;  %4028 = vmatprep.mubr.msk.bf16.mxu1 %vm307_vm1, %v4457_v21  ;;  %v563_v33 = vor.u32 %v562_v24, %v559_v23  ;;  %v4480_v34 = vrot.slane %v749_v26, 4  ;;  %v762_v35 = vshrl.u32 %v4450_v17, 16  ;;  %v4485_v37 = vld [vmem:[%s4421_s27 + $0x70] sm:$0xf]  ;;  %v4502_v45 = vcombine.low %v4460_v22, %v4467_v27 }
  0x17   : > { %v573_v38 = vor.u32 %v572_v28, %v4463_v25  ;;  %v4488_v39 = vrot.slane %v752_v30, 5  ;;  %v4490_v40 = vrot.slane %v758_v31, 5  ;;  %v4494_v42 = vld [vmem:[%s4421_s27 + $0x18] sm:$0xf]  ;;  %v581_v46 = vshrl.u32 %v4460_v22, 16 }
  0x18   : > { %v4496_v43 = vrot.slane %v563_v33, 4  ;;  %v4498_v44 = vrot.slane %v762_v35, 4  ;;  %5993 = vst [vmem:[#allocation4_spill] sm:$0xff] %v4502_v45  ;;  %v4506_v47 = vld [vmem:[%s4421_s27 + $0x1c] sm:$0xf]  ;;  %v584_v49 = vshll.u32 %v4460_v22, 16  ;;  %4013 = vmatmul.mubr.msk.bf16.vlgmr.msra.gmra.mxu0 %vm307_vm1, %v4502_v45  ;;  %v4522_v56 = vcombine.low %v4478_v32, %v4485_v37 }
  0x19   : > { %v4508_v48 = vrot.slane %v573_v38, 4  ;;  %v590_v50 = vshll.u32 %v4467_v27, 16  ;;  %v594_v51 = vshrl.u32 %v4467_v27, 16  ;;  %v4514_v52 = vld [vmem:[%s4421_s27 + $0x78] sm:$0xf]  ;;  %v583_v53 = vrot.slane %v581_v46, 4  ;;  %4079 = vmatpush3.bf16.msra.mxu0 %v1528_v7 }
  0x1a   : > { %v3695_v54 = vrot.slane %v4460_v22, 9  ;;  %v1326_v55 = vrot.slane %v4467_v27, 5  ;;  %5994 = vst [vmem:[#allocation5_spill] sm:$0xff] %v4522_v56  ;;  %v4525_v57 = vld [vmem:[%s4421_s27 + $0x7c] sm:$0xf]  ;;  %v586_v58 = vrot.slane %v584_v49, 5  ;;  %4029 = vmatmul.mubr.msk.bf16.vlgmr.msra.gmra.mxu1 %vm307_vm1, %v4522_v56  ;;  %v4543_v2 = vcombine.low %v4494_v42, %v4506_v47  ;;  %4323 = vmatprep.subr.msk.bf16.mxu0 %vm356_vm0, %v4415_v5 }
  0x1b   : > { %v4527_v59 = vrot.slane %v590_v50, 5  ;;  %v596_v60 = vrot.slane %v594_v51, 4  ;;  %v4531_v62 = vld [vmem:[%s4421_s27 + $0x24] sm:$0xf]  ;;  %v4546_v3 = vld [vmem:[%s4421_s27 + $0x28] sm:$0xf]  ;;  %4045 = vmatpush3.bf16.msra.mxu1 %v4424_v6  ;;  %v4565_v5 = vcombine.low %v4514_v52, %v4525_v57  ;;  %v4685_v6 = vsel %vm4637_vm7, %v3694_v19, %v1319_v20 }
  0x1c   : > { %v4535_v63 = vrot.slane %v1326_v55, 4  ;;  %5995 = vst [vmem:[#allocation6_spill] sm:$0xff] %v4543_v2  ;;  %v587_v7 = vor.u32 %v586_v58, %v583_v53  ;;  %v605_v14 = vshrl.u32 %v4494_v42, 16  ;;  %v4555_v16 = vld [vmem:[%s4421_s27 + $0x84] sm:$0xf]  ;;  %4016 = vmatprep.mubr.msk.bf16.mxu0 %vm307_vm1, %v4543_v2  ;;  %4322 = vmatprep.subr.msk.bf16.mxu1 %vm356_vm0, %v4410_v4  ;;  %v4581_v33 = vcombine.low %v4531_v62, %v4546_v3 }
  0x1d   : > { %v597_v13 = vor.u32 %v596_v60, %v4527_v59  ;;  %v4558_v18 = vld [vmem:[%s4421_s27 + $0x88] sm:$0xf]  ;;  %5996 = vst [vmem:[#allocation7_spill] sm:$0xff] %v4565_v5  ;;  %v4570_v26 = vld [vmem:[%s4421_s27 + $0x30] sm:$0xf]  ;;  %4032 = vmatprep.mubr.msk.bf16.mxu1 %vm307_vm1, %v4565_v5  ;;  %v6005_v41 = vsel %vm4637_vm7, 4294967295, %v6004_v41  ;;  %v569_v58 = vsel %vm4610_vm6, %v4496_v43, %v4463_v25  ;;  %v1327_v10 = vsel %vm4637_vm7, %v3695_v54, %v1326_v55 }
  0x1e   : > { %v4574_v28 = vrot.slane %v587_v7, 4  ;;  %5997 = vst [vmem:[#allocation8_spill] sm:$0xff] %v4581_v33  ;;  %v4584_v35 = vld [vmem:[%s4421_s27 + $0x34] sm:$0xf]  ;;  %v4593_v49 = vcombine.low %v4555_v16, %v4558_v18  ;;  %v4596_v50 = vld [vmem:[%s4421_s27 + $0x90] sm:$0xf] }
  0x1f   : > { %v4576_v30 = vrot.slane %v597_v13, 4  ;;  %v4603_v60 = vcombine.low %v4570_v26, %v4584_v35  ;;  %v4606_v7 = vld [vmem:[%s4421_s27 + $0x94] sm:$0xf]  ;;  %v6000_v13 = vmov 0  ;;  %v4624_v24 = vld [vmem:[%s4421_s27 + $0x3c] sm:$0xf] }
  0x20   : > { %5998 = vst [vmem:[#allocation9_spill] sm:$0xff] %v4593_v49  ;;  %v6001_v13 = vsel %vm4610_vm6, 4294967295, %v6000_v13  ;;  %4017 = vmatmul.mubr.msk.bf16.gmra.mxu0 %vm307_vm1, %v4581_v33  ;;  %v4621_v31 = vcombine.low %v4596_v50, %v4606_v7  ;;  %v4632_v61 = vld [vmem:[%s4421_s27 + $0x40] sm:$0xf]  ;;  %6006 = vst [vmem:[#allocation13_spill] sm:$0xff] %v6005_v41  ;;  %v593_v46 = vsel %vm4610_vm6, %v4574_v28, %v4527_v59  ;;  %v607_v19 = vrot.slane %v605_v14, 4 }
  0x21   : > { %5999 = vst [vmem:[#allocation10_spill] sm:$0xff] %v4603_v60  ;;  %6002 = vst [vmem:[#allocation11_spill] sm:$0xff] %v6001_v13  ;;  %4020 = vmatprep.mubr.msk.bf16.mxu0 %vm307_vm1, %v4603_v60  ;;  %v4645_v1 = vcombine.low %v4624_v24, %v4632_v61  ;;  %v4650_v53 = vld [vmem:[%s4421_s27 + $0x9c] sm:$0xf]  ;;  %v4653_v36 = vld [vmem:[%s4421_s27 + $0xa0] sm:$0xf] }
  0x22   : > { %6003 = vst [vmem:[#allocation12_spill] sm:$0xff] %v4621_v31  ;;  %4033 = vmatmul.mubr.msk.bf16.gmra.mxu1 %vm307_vm1, %v4593_v49  ;;  %v4663_v51 = vcombine.low %v4650_v53, %v4653_v36  ;;  %v4669_v4 = vld [vmem:[%s4421_s27 + $0x48] sm:$0xf]  ;;  %v4672_v38 = vld [vmem:[%s4421_s27 + $0x4c] sm:$0xf]  ;;  %v6012_v15 = vshll.u32 %v4494_v42, 16 }
  0x23   : > { %6007 = vst [vmem:[#allocation14_spill] sm:$0xff] %v4645_v1  ;;  %4036 = vmatprep.mubr.msk.bf16.mxu1 %vm307_vm1, %v4621_v31  ;;  %v4677_v23 = vld [vmem:[%s4421_s27 + $0xa8] sm:$0xf]  ;;  %v4693_v0 = vcombine.low %v4669_v4, %v4672_v38  ;;  %v4697_v11 = vld [vmem:[%s4421_s27 + $0xac] sm:$0xf]  ;;  %v6013_v49 = vshrl.u32 %v4506_v47, 16 }
  0x24   : > { %6008 = vst [vmem:[#allocation15_spill] sm:$0xff] %v4663_v51  ;;  %v4703_v20 = vcombine.low %v4677_v23, %v4697_v11  ;;  %v4707_v28 = vld [vmem:[%s4421_s27 + $0x54] sm:$0xf]  ;;  %v4710_v25 = vld [vmem:[%s4421_s27 + $0x58] sm:$0xf] }
  0x25   : > { %6009 = vst [vmem:[#allocation16_spill] sm:$0xff] %v4693_v0  ;;  %v4722_v43 = vcombine.low %v4707_v28, %v4710_v25  ;;  %v4728_v27 = vld [vmem:[%s4421_s27 + $0xb4] sm:$0xf]  ;;  %v4733_v22 = vld [vmem:[%s4421_s27 + $0xb8] sm:$0xf]  ;;  %v620_v33 = vrot.slane %v6013_v49, 4 }
  0x26   : > { %6010 = vst [vmem:[#allocation17_spill] sm:$0xff] %v4703_v20  ;;  %6011 = vst [vmem:[#allocation18_spill] sm:$0xff] %v4733_v22  ;;  %v174_v14 = vld [vmem:[%s4421_s27 + $0x8] sm:$0x1]  ;;  %v4746_v31 = vcombine.low %v4728_v27, %v4733_v22  ;;  %v177_v56 = vld [vmem:[%s4421_s27 + $0x14] sm:$0x1] }
  0x27   : > { %v576_v5 = vshll.u32 %v174_v14, 16  ;;  %v1322_v54 = vrot.slane %v174_v14, 5  ;;  %v600_v55 = vshll.u32 %v177_v56, 16  ;;  %v1329_v59 = vrot.slane %v177_v56, 5  ;;  %v180_v21 = vld [vmem:[%s4421_s27 + $0x20] sm:$0x1] }
  0x28   : > { %4021 = vmatmul.mubr.msk.bf16.gmra.mxu0 %vm307_vm1, %v4645_v1  ;;  %v610_v1 = vrot.slane %v6012_v15, 5 }
  0x29   : > { %4024 = vmatprep.mubr.msk.bf16.mxu0 %vm307_vm1, %v4693_v0  ;;  %v614_v0 = vshll.u32 %v4506_v47, 16  ;;  %v578_v60 = vrot.slane %v576_v5, 5  ;;  %v1323_v14 = vsel %vm4637_vm7, %v4471_v29, %v1322_v54  ;;  %v602_v2 = vrot.slane %v600_v55, 5 }
  0x2a   : > { %4037 = vmatmul.mubr.msk.bf16.gmra.mxu1 %vm307_vm1, %v4663_v51  ;;  %v624_v51 = vshll.u32 %v180_v21, 16  ;;  %v3711_v56 = vcombine.low %v4685_v6, %v1323_v14  ;;  %v1330_v15 = vsel %vm4637_vm7, %v4535_v63, %v1329_v59  ;;  %v611_v45 = vor.u32 %v610_v1, %v607_v19  ;;  %v183_v59 = vld [vmem:[%s4421_s27 + $0x2c] sm:$0x1] }
  0x2b   : > { %4040 = vmatprep.mubr.msk.bf16.mxu1 %vm307_vm1, %v4703_v20  ;;  %v579_v5 = vsel %vm4610_vm6, %v4508_v48, %v578_v60  ;;  %v4770_v20 = vcombine.low %v1327_v10, %v1330_v15  ;;  %v616_v29 = vrot.slane %v614_v0, 5  ;;  %v603_v6 = vsel %vm4610_vm6, %v4576_v30, %v602_v2 }
  0x2c   : > { %v626_v54 = vrot.slane %v624_v51, 5  ;;  %v3662_v22 = vcombine.low %v569_v58, %v579_v5  ;;  %v612_v49 = vrot.slane %v611_v45, 4  ;;  %v3696_v55 = vrot.slane %v4494_v42, 9 }
  0x2d   : > { %v4776_v14 = vcombine.low %v593_v46, %v603_v6  ;;  %v621_v63 = vor.u32 %v620_v33, %v616_v29  ;;  %v1333_v1 = vrot.slane %v4506_v47, 5  ;;  %v1336_v19 = vrot.slane %v180_v21, 5 }
  0x2e   : > { %v617_v48 = vsel %vm4610_vm6, %v612_v49, %v616_v29  ;;  %v6014_v0 = vshrl.u32 %v4531_v62, 16  ;;  %v6015_v45 = vshll.u32 %v4531_v62, 16  ;;  %v638_v42 = vshll.u32 %v4546_v3, 16 }
  0x2f   : > { %v622_v30 = vrot.slane %v621_v63, 4  ;;  %v1334_v21 = vsel %vm4637_vm7, %v3696_v55, %v1333_v1  ;;  %v1335_v47 = vrot.slane %v1333_v1, 4  ;;  %v6016_v33 = vshrl.u32 %v4546_v3, 16 }
  0x30   : > { %4025 = vmatmul.mubr.msk.bf16.gmra.mxu0 %vm307_vm1, %v4722_v43  ;;  %v631_v51 = vrot.slane %v6014_v0, 4  ;;  %v634_v2 = vrot.slane %v6015_v45, 5  ;;  %v640_v60 = vrot.slane %v638_v42, 5  ;;  %v648_v10 = vshll.u32 %v183_v59, 16  ;;  %v186_v0 = vld [vmem:[%s4421_s27 + $0x38] sm:$0x1] }
  0x31   : > { %4080 = vmatprep.mubr.msk.bf16.mxu0 %vm307_vm1, %v3711_v56  ;;  %v644_v46 = vrot.slane %v6016_v33, 4  ;;  %v3697_v15 = vrot.slane %v4531_v62, 9  ;;  %v627_v56 = vsel %vm4610_vm6, %v622_v30, %v626_v54  ;;  %v1337_v5 = vsel %vm4637_vm7, %v1335_v47, %v1336_v19 }
  0x32   : > { %4041 = vmatmul.mubr.msk.bf16.gmra.mxu1 %vm307_vm1, %v4746_v31  ;;  %v635_v58 = vor.u32 %v634_v2, %v631_v51  ;;  %v1340_v29 = vrot.slane %v4546_v3, 5  ;;  %v1343_v6 = vrot.slane %v183_v59, 5  ;;  %v4803_v49 = vcombine.low %v617_v48, %v627_v56  ;;  %v4836_v56 = vld [vmem:[%s5955_s1 + $0xa] sm:$0x3] }
  0x33   : > { %4046 = vmatprep.mubr.msk.bf16.mxu1 %vm307_vm1, %v3662_v22  ;;  %v4805_v55 = vcombine.low %v1334_v21, %v1337_v5  ;;  %v645_v1 = vor.u32 %v644_v46, %v640_v60  ;;  %v650_v51 = vrot.slane %v648_v10, 5  ;;  %v6017_v54 = vshrl.u32 %v4570_v26, 16  ;;  %v4825_v46 = vld [vmem:[%s5955_s1 + $0xc] sm:$0x3] }
  0x34   : > { %v636_v63 = vrot.slane %v635_v58, 4  ;;  %v1341_v62 = vsel %vm4637_vm7, %v3697_v15, %v1340_v29  ;;  %v1342_v22 = vrot.slane %v1340_v29, 4  ;;  %v6018_v59 = vshll.u32 %v4570_v26, 16 }
  0x35   : > { %v655_v45 = vrot.slane %v6017_v54, 4  ;;  %v646_v3 = vrot.slane %v645_v1, 4  ;;  %v662_v2 = vshll.u32 %v4584_v35, 16  ;;  %v6019_v30 = vshrl.u32 %v4584_v35, 16 }
  0x36   : > { %v641_v19 = vsel %vm4610_vm6, %v636_v63, %v640_v60  ;;  %v658_v48 = vrot.slane %v6018_v59, 5  ;;  %v1344_v42 = vsel %vm4637_vm7, %v1342_v22, %v1343_v6  ;;  %v672_v47 = vshll.u32 %v186_v0, 16  ;;  %v189_v63 = vld [vmem:[%s4421_s27 + $0x44] sm:$0x1] }
  0x37   : > { %v668_v21 = vrot.slane %v6019_v30, 4  ;;  %v3698_v33 = vrot.slane %v4570_v26, 9  ;;  %v651_v58 = vsel %vm4610_vm6, %v646_v3, %v650_v51  ;;  %v4831_v60 = vcombine.low %v1341_v62, %v1344_v42 }
  0x38   : > { %4081 = vmatmul.mubr.msk.bf16.vlgmr.msra.gmra.mxu0 %vm307_vm1, %v4770_v20  ;;  %v659_v10 = vor.u32 %v658_v48, %v655_v45  ;;  %v664_v15 = vrot.slane %v662_v2, 5  ;;  %v4841_v26 = vcombine.low %v641_v19, %v651_v58  ;;  %v674_v5 = vrot.slane %v672_v47, 5 }
  0x39   : > { %4147 = vmatpush3.bf16.msra.mxu0 %v4433_v9  ;;  %4084 = vmatprep.mubr.msk.bf16.mxu0 %vm307_vm1, %v4805_v55  ;;  %v1347_v29 = vrot.slane %v4584_v35, 5  ;;  %v1350_v6 = vrot.slane %v186_v0, 5  ;;  %v6020_v62 = vshrl.u32 %v4624_v24, 16  ;;  %v6021_v9 = vshll.u32 %v4624_v24, 16 }
  0x3a   : > { %4047 = vmatmul.mubr.msk.bf16.vlgmr.msra.gmra.mxu1 %vm307_vm1, %v4776_v14  ;;  %v660_v1 = vrot.slane %v659_v10, 4  ;;  %v669_v51 = vor.u32 %v668_v21, %v664_v15  ;;  %4325 = vmatprep.subr.msk.bf16.mxu0 %vm356_vm0, %v4825_v46  ;;  %v686_v45 = vshll.u32 %v4632_v61, 16  ;;  %v6022_v19 = vshrl.u32 %v4632_v61, 16 }
  0x3b   : > { %v679_v22 = vrot.slane %v6020_v62, 4  ;;  %v682_v54 = vrot.slane %v6021_v9, 5  ;;  %4113 = vmatpush3.bf16.msra.mxu1 %v4429_v8  ;;  %4050 = vmatprep.mubr.msk.bf16.mxu1 %vm307_vm1, %v4803_v49  ;;  %v1348_v35 = vsel %vm4637_vm7, %v3698_v33, %v1347_v29  ;;  %v1349_v0 = vrot.slane %v1347_v29, 4  ;;  %v192_v29 = vld [vmem:[%s4421_s27 + $0x50] sm:$0x1] }
  0x3c   : > { %v692_v3 = vrot.slane %v6022_v19, 4  ;;  %v665_v59 = vsel %vm4610_vm6, %v660_v1, %v664_v15  ;;  %v670_v48 = vrot.slane %v669_v51, 4  ;;  %v696_v42 = vshll.u32 %v189_v63, 16  ;;  %4324 = vmatprep.subr.msk.bf16.mxu1 %vm356_vm0, %v4836_v56 }
  0x3d   : > { %v683_v2 = vor.u32 %v682_v54, %v679_v22  ;;  %v1351_v8 = vsel %vm4637_vm7, %v1349_v0, %v1350_v6  ;;  %v688_v30 = vrot.slane %v686_v45, 5  ;;  %v3699_v21 = vrot.slane %v4624_v24, 9 }
  0x3e   : > { %v1354_v47 = vrot.slane %v4632_v61, 5  ;;  %v675_v33 = vsel %vm4610_vm6, %v670_v48, %v674_v5  ;;  %v4871_v58 = vcombine.low %v1348_v35, %v1351_v8  ;;  %v698_v15 = vrot.slane %v696_v42, 5 }
  0x3f   : > { %v684_v10 = vrot.slane %v683_v2, 4  ;;  %v4874_v1 = vcombine.low %v665_v59, %v675_v33  ;;  %v693_v51 = vor.u32 %v692_v3, %v688_v30  ;;  %v1357_v24 = vrot.slane %v189_v63, 5 }
  0x40   : > { %v1355_v62 = vsel %vm4637_vm7, %v3699_v21, %v1354_v47  ;;  %v1356_v6 = vrot.slane %v1354_v47, 4  ;;  %4085 = vmatmul.mubr.msk.bf16.gmra.mxu0 %vm307_vm1, %v4831_v60  ;;  %v6023_v5 = vshrl.u32 %v4669_v4, 16  ;;  %v6024_v9 = vshll.u32 %v4669_v4, 16  ;;  %v195_v47 = vld [vmem:[%s4421_s27 + $0x5c] sm:$0x1] }
  0x41   : > { %v689_v61 = vsel %vm4610_vm6, %v684_v10, %v688_v30  ;;  %4088 = vmatprep.mubr.msk.bf16.mxu0 %vm307_vm1, %v4871_v58  ;;  %v694_v35 = vrot.slane %v693_v51, 4  ;;  %v710_v0 = vshll.u32 %v4672_v38, 16  ;;  %v6025_v45 = vshrl.u32 %v4672_v38, 16 }
  0x42   : > { %v703_v22 = vrot.slane %v6023_v5, 4  ;;  %v706_v54 = vrot.slane %v6024_v9, 5  ;;  %v720_v3 = vshll.u32 %v192_v29, 16  ;;  %4051 = vmatmul.mubr.msk.bf16.gmra.mxu1 %vm307_vm1, %v4841_v26  ;;  %v1358_v63 = vsel %vm4637_vm7, %v1356_v6, %v1357_v24 }
  0x43   : > { %v716_v19 = vrot.slane %v6025_v45, 4  ;;  %v3700_v48 = vrot.slane %v4669_v4, 9  ;;  %v1361_v2 = vrot.slane %v4672_v38, 5  ;;  %4054 = vmatprep.mubr.msk.bf16.mxu1 %vm307_vm1, %v4874_v1  ;;  %v699_v42 = vsel %vm4610_vm6, %v694_v35, %v698_v15 }
  0x44   : > { %v707_v59 = vor.u32 %v706_v54, %v703_v22  ;;  %v4901_v8 = vcombine.low %v1355_v62, %v1358_v63  ;;  %v712_v30 = vrot.slane %v710_v0, 5  ;;  %v722_v21 = vrot.slane %v720_v3, 5 }
  0x45   : > { %v4904_v33 = vcombine.low %v689_v61, %v699_v42  ;;  %v1362_v51 = vsel %vm4637_vm7, %v3700_v48, %v1361_v2  ;;  %v1363_v4 = vrot.slane %v1361_v2, 4  ;;  %v1364_v38 = vrot.slane %v192_v29, 5  ;;  %v198_v2 = vld [vmem:[%s4421_s27 + $0x68] sm:$0x1] }
  0x46   : > { %v708_v10 = vrot.slane %v707_v59, 4  ;;  %v717_v6 = vor.u32 %v716_v19, %v712_v30  ;;  %v6026_v24 = vshrl.u32 %v4707_v28, 16  ;;  %v6027_v15 = vshll.u32 %v4707_v28, 16 }
  0x47   : > { %v734_v61 = vshll.u32 %v4710_v25, 16  ;;  %v6028_v9 = vshrl.u32 %v4710_v25, 16  ;;  %v744_v35 = vshll.u32 %v195_v47, 16  ;;  %v1365_v29 = vsel %vm4637_vm7, %v1363_v4, %v1364_v38 }
  0x48   : > { %v727_v5 = vrot.slane %v6026_v24, 4  ;;  %v730_v62 = vrot.slane %v6027_v15, 5  ;;  %v713_v22 = vsel %vm4610_vm6, %v708_v10, %v712_v30  ;;  %v718_v0 = vrot.slane %v717_v6, 4  ;;  %4089 = vmatmul.mubr.msk.bf16.gmra.mxu0 %vm307_vm1, %v4901_v8 }
  0x49   : > { %v740_v54 = vrot.slane %v6028_v9, 4  ;;  %v3701_v19 = vrot.slane %v4707_v28, 9  ;;  %v4922_v3 = vcombine.low %v1362_v51, %v1365_v29  ;;  %v736_v63 = vrot.slane %v734_v61, 5 }
  0x4a   : > { %v731_v45 = vor.u32 %v730_v62, %v727_v5  ;;  %v746_v59 = vrot.slane %v744_v35, 5  ;;  %v1368_v48 = vrot.slane %v4710_v25, 5  ;;  %v723_v42 = vsel %vm4610_vm6, %v718_v0, %v722_v21  ;;  %4055 = vmatmul.mubr.msk.bf16.gmra.mxu1 %vm307_vm1, %v4904_v33 }
  0x4b   : > { %v1371_v10 = vrot.slane %v195_v47, 5  ;;  %v6029_v4 = vor.u32 %v4488_v39, %v4480_v34  ;;  %v4933_v28 = vcombine.low %v713_v22, %v723_v42  ;;  %4092 = vmatprep.mubr.msk.bf16.mxu0 %vm307_vm1, %v4922_v3  ;;  %v741_v25 = vor.u32 %v740_v54, %v736_v63 }
  0x4c   : > { %v732_v30 = vrot.slane %v731_v45, 4  ;;  %v1369_v51 = vsel %vm4637_vm7, %v3701_v19, %v1368_v48  ;;  %v1370_v21 = vrot.slane %v1368_v48, 4  ;;  %v6030_v39 = vor.u32 %v4498_v44, %v4490_v40 }
  0x4d   : > { %v756_v6 = vrot.slane %v6029_v4, 4  ;;  %v768_v24 = vshll.u32 %v198_v2, 16  ;;  %4058 = vmatprep.mubr.msk.bf16.mxu1 %vm307_vm1, %v4933_v28  ;;  %v742_v5 = vrot.slane %v741_v25, 4  ;;  %v6031_v62 = vrot.slane %v4450_v17, 5 }
  0x4e   : > { %v737_v47 = vsel %vm4610_vm6, %v732_v30, %v736_v63  ;;  %v766_v38 = vrot.slane %v6030_v39, 4  ;;  %v1372_v15 = vsel %vm4637_vm7, %v1370_v21, %v1371_v10  ;;  %v6032_v22 = vrot.slane %v4442_v12, 9 }
  0x4f   : > { %v761_v34 = vsel %vm4610_vm6, %v756_v6, %v4490_v40  ;;  %v6033_v9 = vmov %v6031_v62  ;;  %v201_v40 = vld [vmem:[%s4421_s27 + $0x74] sm:$0x1]  ;;  %v4960_v44 = vcombine.low %v1369_v51, %v1372_v15  ;;  %v770_v35 = vrot.slane %v768_v24, 5 }
  0x50   : > { %v1376_v61 = vsel %vm4637_vm7, %v6032_v22, %v6031_v62  ;;  %v1377_v54 = vrot.slane %v6033_v9, 4  ;;  %v1378_v0 = vrot.slane %v198_v2, 5  ;;  %v6034_v29 = vshrl.u32 %v4478_v32, 16 }
  0x51   : > { %v747_v19 = vsel %vm4610_vm6, %v742_v5, %v746_v59  ;;  %v6035_v63 = vshll.u32 %v4478_v32, 16  ;;  %v782_v48 = vshll.u32 %v4485_v37, 16  ;;  %v6036_v17 = vshrl.u32 %v4485_v37, 16  ;;  %4093 = vmatmul.mubr.msk.bf16.gmra.mxu0 %vm307_vm1, %v4960_v44 }
  0x52   : > { %v775_v45 = vrot.slane %v6034_v29, 4  ;;  %v4971_v30 = vcombine.low %v737_v47, %v747_v19  ;;  %v771_v2 = vsel %vm4610_vm6, %v766_v38, %v770_v35  ;;  %v1379_v10 = vsel %vm4637_vm7, %v1377_v54, %v1378_v0  ;;  %v204_v38 = vld [vmem:[%s4421_s27 + $0x80] sm:$0x1] }
  0x53   : > { %v778_v12 = vrot.slane %v6035_v63, 5  ;;  %v788_v42 = vrot.slane %v6036_v17, 4  ;;  %v792_v4 = vshll.u32 %v201_v40, 16  ;;  %v4979_v59 = vcombine.low %v761_v34, %v771_v2 }
  0x54   : > { %v4981_v6 = vcombine.low %v1376_v61, %v1379_v10  ;;  %v784_v51 = vrot.slane %v782_v48, 5  ;;  %v3703_v47 = vrot.slane %v4478_v32, 9  ;;  %v1382_v39 = vrot.slane %v4485_v37, 5  ;;  %4059 = vmatmul.mubr.msk.bf16.gmra.mxu1 %vm307_vm1, %v4971_v30 }
  0x55   : > { %v779_v25 = vor.u32 %v778_v12, %v775_v45  ;;  %v794_v21 = vrot.slane %v792_v4, 5  ;;  %v1385_v24 = vrot.slane %v201_v40, 5  ;;  %v6037_v15 = vshrl.u32 %v4514_v52, 16  ;;  %4062 = vmatprep.mubr.msk.bf16.mxu1 %vm307_vm1, %v4979_v59  ;;  %v207_v4 = vld [vmem:[%s4421_s27 + $0x8c] sm:$0x1] }
  0x56   : > { %4096 = vmatprep.mubr.msk.bf16.mxu0 %vm307_vm1, %v4981_v6  ;;  %v789_v34 = vor.u32 %v788_v42, %v784_v51  ;;  %v6038_v22 = vshll.u32 %v4514_v52, 16  ;;  %v1383_v32 = vsel %vm4637_vm7, %v3703_v47, %v1382_v39  ;;  %v1384_v37 = vrot.slane %v1382_v39, 4 }
  0x57   : > { %v780_v5 = vrot.slane %v779_v25, 4  ;;  %v799_v62 = vrot.slane %v6037_v15, 4  ;;  %v806_v9 = vshll.u32 %v4525_v57, 16  ;;  %v6039_v54 = vshrl.u32 %v4525_v57, 16 }
  0x58   : > { %v802_v61 = vrot.slane %v6038_v22, 5  ;;  %v790_v0 = vrot.slane %v789_v34, 4  ;;  %v816_v45 = vshll.u32 %v204_v38, 16  ;;  %v1386_v19 = vsel %vm4637_vm7, %v1384_v37, %v1385_v24 }
  0x59   : > { %v812_v40 = vrot.slane %v6039_v54, 4  ;;  %v785_v35 = vsel %vm4610_vm6, %v780_v5, %v784_v51  ;;  %v808_v63 = vrot.slane %v806_v9, 5  ;;  %v3704_v12 = vrot.slane %v4514_v52, 9 }
  0x5a   : > { %v803_v29 = vor.u32 %v802_v61, %v799_v62  ;;  %v1389_v48 = vrot.slane %v4525_v57, 5  ;;  %v795_v17 = vsel %vm4610_vm6, %v790_v0, %v794_v21  ;;  %v5009_v42 = vcombine.low %v1383_v32, %v1386_v19 }
  0x5b   : > { %v818_v10 = vrot.slane %v816_v45, 5  ;;  %v5012_v25 = vcombine.low %v785_v35, %v795_v17  ;;  %v813_v51 = vor.u32 %v812_v40, %v808_v63  ;;  %v1392_v57 = vrot.slane %v204_v38, 5  ;;  %v210_v45 = vld [vmem:[%s4421_s27 + $0x98] sm:$0x1] }
  0x5c   : > { %v804_v2 = vrot.slane %v803_v29, 4  ;;  %v1390_v47 = vsel %vm4637_vm7, %v3704_v12, %v1389_v48  ;;  %v1391_v39 = vrot.slane %v1389_v48, 4  ;;  %4097 = vmatmul.mubr.msk.bf16.gmra.mxu0 %vm307_vm1, %v5009_v42  ;;  %v6040_v21 = vshrl.u32 %v4555_v16, 16 }
  0x5d   : > { %v6041_v5 = vshll.u32 %v4555_v16, 16  ;;  %v814_v15 = vrot.slane %v813_v51, 4  ;;  %v830_v62 = vshll.u32 %v4558_v18, 16  ;;  %v6042_v22 = vshrl.u32 %v4558_v18, 16  ;;  %4063 = vmatmul.mubr.msk.bf16.gmra.mxu1 %vm307_vm1, %v5012_v25 }
  0x5e   : > { %v809_v52 = vsel %vm4610_vm6, %v804_v2, %v808_v63  ;;  %v823_v24 = vrot.slane %v6040_v21, 4  ;;  %v840_v32 = vshll.u32 %v207_v4, 16  ;;  %v1393_v38 = vsel %vm4637_vm7, %v1391_v39, %v1392_v57 }
  0x5f   : > { %v826_v34 = vrot.slane %v6041_v5, 5  ;;  %v836_v61 = vrot.slane %v6042_v22, 4  ;;  %v3705_v9 = vrot.slane %v4555_v16, 9  ;;  %v1396_v54 = vrot.slane %v4558_v18, 5 }
  0x60   : > { %v819_v40 = vsel %vm4610_vm6, %v814_v15, %v818_v10  ;;  %v5035_v35 = vcombine.low %v1390_v47, %v1393_v38  ;;  %v832_v0 = vrot.slane %v830_v62, 5  ;;  %v842_v29 = vrot.slane %v840_v32, 5 }
  0x61   : > { %v827_v37 = vor.u32 %v826_v34, %v823_v24  ;;  %v5038_v19 = vcombine.low %v809_v52, %v819_v40  ;;  %v1397_v12 = vsel %vm4637_vm7, %v3705_v9, %v1396_v54  ;;  %v1398_v48 = vrot.slane %v1396_v54, 4  ;;  %v213_v9 = vld [vmem:[%s4421_s27 + $0xa4] sm:$0x1] }
  0x62   : > { %4100 = vmatprep.mubr.msk.bf16.mxu0 %vm307_vm1, %v5035_v35  ;;  %v837_v16 = vor.u32 %v836_v61, %v832_v0  ;;  %v1399_v18 = vrot.slane %v207_v4, 5  ;;  %v6043_v17 = vshrl.u32 %v4596_v50, 16  ;;  %v6044_v10 = vshll.u32 %v4596_v50, 16 }
  0x63   : > { %v828_v63 = vrot.slane %v827_v37, 4  ;;  %4066 = vmatprep.mubr.msk.bf16.mxu1 %vm307_vm1, %v5038_v19  ;;  %v854_v39 = vshll.u32 %v4606_v7, 16  ;;  %v6045_v52 = vshrl.u32 %v4606_v7, 16  ;;  %v864_v21 = vshll.u32 %v210_v45, 16 }
  0x64   : > { %v847_v2 = vrot.slane %v6043_v17, 4  ;;  %v850_v51 = vrot.slane %v6044_v10, 5  ;;  %v838_v4 = vrot.slane %v837_v16, 4  ;;  %v1400_v24 = vsel %vm4637_vm7, %v1398_v48, %v1399_v18 }
  0x65   : > { %v833_v47 = vsel %vm4610_vm6, %v828_v63, %v832_v0  ;;  %v860_v57 = vrot.slane %v6045_v52, 4  ;;  %v3706_v34 = vrot.slane %v4596_v50, 9  ;;  %v5058_v15 = vcombine.low %v1397_v12, %v1400_v24 }
  0x66   : > { %v851_v5 = vor.u32 %v850_v51, %v847_v2  ;;  %v856_v62 = vrot.slane %v854_v39, 5  ;;  %v866_v22 = vrot.slane %v864_v21, 5  ;;  %v1403_v61 = vrot.slane %v4606_v7, 5 }
  0x67   : > { %v843_v32 = vsel %vm4610_vm6, %v838_v4, %v842_v29  ;;  %v1406_v37 = vrot.slane %v210_v45, 5  ;;  %v6046_v54 = vshrl.u32 %v4650_v53, 16  ;;  %4101 = vmatmul.mubr.msk.bf16.gmra.mxu0 %vm307_vm1, %v5058_v15  ;;  %v6047_v29 = vshll.u32 %v4650_v53, 16 }
  0x68   : > { %v852_v38 = vrot.slane %v851_v5, 4  ;;  %v5066_v0 = vcombine.low %v833_v47, %v843_v32  ;;  %v861_v50 = vor.u32 %v860_v57, %v856_v62  ;;  %v1404_v63 = vsel %vm4637_vm7, %v3706_v34, %v1403_v61  ;;  %v216_v5 = vld [vmem:[%s4421_s27 + $0xb0] sm:$0x1] }
  0x69   : > { %v871_v40 = vrot.slane %v6046_v54, 4  ;;  %v1405_v12 = vrot.slane %v1403_v61, 4  ;;  %v874_v45 = vrot.slane %v6047_v29, 5  ;;  %v878_v48 = vshll.u32 %v4653_v36, 16 }
  0x6a   : > { %v857_v7 = vsel %vm4610_vm6, %v852_v38, %v856_v62  ;;  %v6048_v16 = vshrl.u32 %v4653_v36, 16  ;;  %4067 = vmatmul.mubr.msk.bf16.gmra.mxu1 %vm307_vm1, %v5066_v0  ;;  %v862_v17 = vrot.slane %v861_v50, 4  ;;  %v888_v10 = vshll.u32 %v213_v9, 16 }
  0x6b   : > { %v1407_v2 = vsel %vm4637_vm7, %v1405_v12, %v1406_v37  ;;  %v3707_v51 = vrot.slane %v4650_v53, 9  ;;  %v875_v39 = vor.u32 %v874_v45, %v871_v40  ;;  %v880_v52 = vrot.slane %v878_v48, 5 }
  0x6c   : > { %v884_v18 = vrot.slane %v6048_v16, 4  ;;  %v5084_v47 = vcombine.low %v1404_v63, %v1407_v2  ;;  %v1410_v57 = vrot.slane %v4653_v36, 5  ;;  %v867_v21 = vsel %vm4610_vm6, %v862_v17, %v866_v22 }
  0x6d   : > { %v890_v4 = vrot.slane %v888_v10, 5  ;;  %v1413_v24 = vrot.slane %v213_v9, 5  ;;  %v6049_v34 = vshrl.u32 %v4677_v23, 16  ;;  %v5092_v61 = vcombine.low %v857_v7, %v867_v21 }
  0x6e   : > { %4104 = vmatprep.mubr.msk.bf16.mxu0 %vm307_vm1, %v5084_v47  ;;  %v876_v53 = vrot.slane %v875_v39, 4  ;;  %v885_v32 = vor.u32 %v884_v18, %v880_v52  ;;  %v1411_v38 = vsel %vm4637_vm7, %v3707_v51, %v1410_v57  ;;  %v1412_v36 = vrot.slane %v1410_v57, 4  ;;  %v219_v51 = vld [vmem:[%s4421_s27 + $0xbc] sm:$0x1] }
  0x6f   : > { %v895_v62 = vrot.slane %v6049_v34, 4  ;;  %v6050_v37 = vshll.u32 %v4677_v23, 16  ;;  %v902_v9 = vshll.u32 %v4697_v11, 16  ;;  %v6051_v54 = vshrl.u32 %v4697_v11, 16  ;;  %4070 = vmatprep.mubr.msk.bf16.mxu1 %vm307_vm1, %v5092_v61 }
  0x70   : > { %v881_v50 = vsel %vm4610_vm6, %v876_v53, %v880_v52  ;;  %v886_v63 = vrot.slane %v885_v32, 4  ;;  %v912_v12 = vshll.u32 %v216_v5, 16  ;;  %v3708_v7 = vrot.slane %v4677_v23, 9 }
  0x71   : > { %v898_v22 = vrot.slane %v6050_v37, 5  ;;  %v908_v40 = vrot.slane %v6051_v54, 4  ;;  %v1414_v29 = vsel %vm4637_vm7, %v1412_v36, %v1413_v24  ;;  %v904_v48 = vrot.slane %v902_v9, 5 }
  0x72   : > { %v1417_v16 = vrot.slane %v4697_v11, 5  ;;  %v891_v18 = vsel %vm4610_vm6, %v886_v63, %v890_v4  ;;  %v5113_v17 = vcombine.low %v1411_v38, %v1414_v29  ;;  %v914_v2 = vrot.slane %v912_v12, 5 }
  0x73   : > { %v899_v45 = vor.u32 %v898_v22, %v895_v62  ;;  %v1420_v10 = vrot.slane %v216_v5, 5  ;;  %v5116_v39 = vcombine.low %v881_v50, %v891_v18  ;;  %v909_v57 = vor.u32 %v908_v40, %v904_v48  ;;  %v6054_v62 = vld [vmem:[#allocation18_spill] sm:$0xff] }
  0x74   : > { %v1418_v23 = vsel %vm4637_vm7, %v3708_v7, %v1417_v16  ;;  %4105 = vmatmul.mubr.msk.bf16.gmra.mxu0 %vm307_vm1, %v5113_v17  ;;  %v1419_v21 = vrot.slane %v1417_v16, 4  ;;  %v6052_v11 = vshrl.u32 %v4728_v27, 16  ;;  %v6053_v4 = vshll.u32 %v4728_v27, 16 }
  0x75   : > { %v900_v52 = vrot.slane %v899_v45, 4  ;;  %v926_v5 = vshll.u32 %v6054_v62, 16  ;;  %4071 = vmatmul.mubr.msk.bf16.gmra.mxu1 %vm307_vm1, %v5116_v39  ;;  %v910_v32 = vrot.slane %v909_v57, 4  ;;  %v6055_v38 = vshrl.u32 %v6054_v62, 16 }
  0x76   : > { %v919_v24 = vrot.slane %v6052_v11, 4  ;;  %v922_v34 = vrot.slane %v6053_v4, 5  ;;  %v936_v37 = vshll.u32 %v219_v51, 16  ;;  %v1421_v22 = vsel %vm4637_vm7, %v1419_v21, %v1420_v10  ;;  %v5160_v21 = vld [vmem:[%s4421_s27 + $0xc0] sm:$0xf] }
  0x77   : > { %v905_v53 = vsel %vm4610_vm6, %v900_v52, %v904_v48  ;;  %v932_v36 = vrot.slane %v6055_v38, 4  ;;  %v928_v54 = vrot.slane %v926_v5, 5  ;;  %v3709_v40 = vrot.slane %v4728_v27, 9  ;;  %v5163_v11 = vld [vmem:[%s4421_s27 + $0xc4] sm:$0xf]  ;;  %v6058_v5 = vld [vmem:[#allocation4_spill] sm:$0xff] }
  0x78   : > { %v923_v9 = vor.u32 %v922_v34, %v919_v24  ;;  %v915_v50 = vsel %vm4610_vm6, %v910_v32, %v914_v2  ;;  %v5138_v63 = vcombine.low %v1418_v23, %v1421_v22  ;;  %v938_v12 = vrot.slane %v936_v37, 5  ;;  %v222_v24 = vld [vmem:[%s4421_s27 + $0xc8] sm:$0x1] }
  0x79   : > { %v1424_v7 = vrot.slane %v6054_v62, 5  ;;  %v5141_v29 = vcombine.low %v905_v53, %v915_v50  ;;  %v933_v48 = vor.u32 %v932_v36, %v928_v54  ;;  %v1427_v16 = vrot.slane %v219_v51, 5  ;;  %v6063_v50 = vld [vmem:[#allocation16_spill] sm:$0xff] }
  0x7a   : > { %v924_v45 = vrot.slane %v923_v9, 4  ;;  %4108 = vmatprep.mubr.msk.bf16.mxu0 %vm307_vm1, %v5138_v63  ;;  %v3779_v4 = vrot.slane %v5160_v21, 9  ;;  %v2352_v34 = vrot.slane %v5163_v11, 5  ;;  %v2355_v62 = vrot.slane %v222_v24, 5  ;;  %v6059_v9 = vld [vmem:[#allocation6_spill] sm:$0xff] }
  0x7b   : > { %v1425_v27 = vsel %vm4637_vm7, %v3709_v40, %v1424_v7  ;;  %v1426_v18 = vrot.slane %v1424_v7, 4  ;;  %4074 = vmatprep.mubr.msk.bf16.mxu1 %vm307_vm1, %v5141_v29  ;;  %v934_v10 = vrot.slane %v933_v48, 4  ;;  %v2636_v37 = vsel %vm356_vm0, %v4825_v46, 0  ;;  %v6060_v46 = vld [vmem:[#allocation8_spill] sm:$0xff]  ;;  %v6062_v40 = vld [vmem:[#allocation14_spill] sm:$0xff]  ;;  %v6065_v7 = vld [vmem:[#allocation5_spill] sm:$0xff] }
  0x7c   : > { %v929_v2 = vsel %vm4610_vm6, %v924_v45, %v928_v54  ;;  %v2353_v53 = vsel %vm4637_vm7, %v3779_v4, %v2352_v34  ;;  %v2354_v32 = vrot.slane %v2352_v34, 4  ;;  %v2366_v22 = vsel %vm356_vm0, %v4836_v56, 0  ;;  %v3835_v54 = vld [vmem:[%s5955_s1 + $0x10] sm:$0x3]  ;;  %v6061_v56 = vld [vmem:[#allocation10_spill] sm:$0xff]  ;;  %v6066_v45 = vld [vmem:[#allocation7_spill] sm:$0xff] }
  0x7d   : > { %v1428_v52 = vsel %vm4637_vm7, %v1426_v18, %v1427_v16  ;;  %v939_v51 = vsel %vm4610_vm6, %v934_v10, %v938_v12  ;;  %v6064_v12 = vld [vmem:[#allocation3_spill] sm:$0xff]  ;;  %v2058_v48 = vshrl.u32 %v5160_v21, 16  ;;  %v2061_v16 = vshll.u32 %v5160_v21, 16  ;;  %v6068_v34 = vld [vmem:[#allocation12_spill] sm:$0xff] }
  0x7e   : > { %v5155_v57 = vcombine.low %v1425_v27, %v1428_v52  ;;  %v5157_v23 = vcombine.low %v929_v2, %v939_v51  ;;  %v2356_v38 = vsel %vm4637_vm7, %v2354_v32, %v2355_v62  ;;  %v2071_v27 = vshrl.u32 %v5163_v11, 16  ;;  %v6067_v2 = vld [vmem:[#allocation9_spill] sm:$0xff]  ;;  %v6069_v32 = vld [vmem:[#allocation15_spill] sm:$0xff] }
  0x7f   : > { %v5180_v36 = vcombine.low %v2353_v53, %v2356_v38  ;;  %v2067_v18 = vshll.u32 %v5163_v11, 16  ;;  %v2060_v10 = vrot.slane %v2058_v48, 4  ;;  %v2063_v52 = vrot.slane %v2061_v16, 5  ;;  %v6070_v48 = vld [vmem:[#allocation17_spill] sm:$0xff] }
  0x80   : > { %6056 = vst [vmem:[#allocation18_spill] sm:$0xff] %v5155_v57  ;;  %6057 = vst [vmem:[#allocation19_spill] sm:$0xff] %v5157_v23  ;;  %4109 = vmatmul.mubr.msk.bf16.gmra.mxu0 %vm307_vm1, %v5155_v57  ;;  %4075 = vmatmul.mubr.msk.bf16.gmra.mxu1 %vm307_vm1, %v5157_v23  ;;  %v2073_v4 = vrot.slane %v2071_v27, 4  ;;  %v2077_v53 = vshll.u32 %v222_v24, 16 }
  0x81   : > { %4148 = vmatprep.mubr.msk.bf16.mxu0 %vm307_vm1, %v4776_v14  ;;  %4114 = vmatprep.mubr.msk.bf16.mxu1 %vm307_vm1, %v6058_v5  ;;  %v3816_v14 = vld [vmem:[%s5955_s1 + $0xe] sm:$0x3]  ;;  %v2069_v51 = vrot.slane %v2067_v18, 5  ;;  %v2064_v62 = vor.u32 %v2063_v52, %v2060_v10  ;;  %v3744_v18 = vcombine.low %v5160_v21, %v5163_v11  ;;  %v3204_v10 = vsel %vm356_vm0, %v3835_v54, 0 }
  0x82   : > { %v2928_v52 = vsel %vm356_vm0, %v3816_v14, 0 }
  0x83   : > { %v2074_v5 = vor.u32 %v2073_v4, %v2069_v51  ;;  %v2065_v38 = vrot.slane %v2064_v62, 4 }
  0x85   : > { %v2070_v16 = vsel %vm4610_vm6, %v2065_v38, %v2069_v51 }
  0x88   : > { %4149 = vmatmul.mubr.msk.bf16.vlgmr.msra.gmra.mxu0 %vm307_vm1, %v4803_v49  ;;  %4115 = vmatmul.mubr.msk.bf16.vlgmr.msra.gmra.mxu1 %vm307_vm1, %v6059_v9 }
  0x89   : > { %4215 = vmatpush3.bf16.msra.mxu0 %v2636_v37  ;;  %4181 = vmatpush3.bf16.msra.mxu1 %v2366_v22  ;;  %v2075_v37 = vrot.slane %v2074_v5, 4  ;;  %v2079_v22 = vrot.slane %v2077_v53, 5 }
  0x8a   : > { %4118 = vmatprep.mubr.msk.bf16.mxu1 %vm307_vm1, %v6060_v46  ;;  %4152 = vmatprep.mubr.msk.bf16.mxu0 %vm307_vm1, %v4841_v26 }
  0x8b   : > { %4326 = vmatprep.subr.msk.bf16.mxu1 %vm356_vm0, %v3816_v14  ;;  %4327 = vmatprep.subr.msk.bf16.mxu0 %vm356_vm0, %v3835_v54  ;;  %v2080_v24 = vsel %vm4610_vm6, %v2075_v37, %v2079_v22 }
  0x8c   : > { %v5258_v27 = vcombine.low %v2070_v16, %v2080_v24  ;;  %v5372_v16 = vld [vmem:[%s4421_s27 + $0xd0] sm:$0xf] }
  0x8e   : > { %6071 = vst [vmem:[#allocation4_spill] sm:$0xff] %v5258_v27 }
  0x90   : > { %4153 = vmatmul.mubr.msk.bf16.gmra.mxu0 %vm307_vm1, %v4874_v1  ;;  %4119 = vmatmul.mubr.msk.bf16.gmra.mxu1 %vm307_vm1, %v6061_v56 }
  0x91   : > { %4156 = vmatprep.mubr.msk.bf16.mxu0 %vm307_vm1, %v4904_v33  ;;  %4122 = vmatprep.mubr.msk.bf16.mxu1 %vm307_vm1, %v6062_v40 }
  0x98   : > { %4157 = vmatmul.mubr.msk.bf16.gmra.mxu0 %vm307_vm1, %v4933_v28  ;;  %4123 = vmatmul.mubr.msk.bf16.gmra.mxu1 %vm307_vm1, %v6063_v50 }
  0x99   : > { %4160 = vmatprep.mubr.msk.bf16.mxu0 %vm307_vm1, %v4971_v30  ;;  %4126 = vmatprep.mubr.msk.bf16.mxu1 %vm307_vm1, %v4722_v43 }
  0xa0   : > { %4161 = vmatmul.mubr.msk.bf16.gmra.mxu0 %vm307_vm1, %v4979_v59  ;;  %4127 = vmatmul.mubr.msk.bf16.gmra.mxu1 %vm307_vm1, %v6064_v12 }
  0xa1   : > { %4164 = vmatprep.mubr.msk.bf16.mxu0 %vm307_vm1, %v5012_v25  ;;  %4130 = vmatprep.mubr.msk.bf16.mxu1 %vm307_vm1, %v6065_v7 }
  0xa8   : > { %4165 = vmatmul.mubr.msk.bf16.gmra.mxu0 %vm307_vm1, %v5038_v19  ;;  %4131 = vmatmul.mubr.msk.bf16.gmra.mxu1 %vm307_vm1, %v6066_v45 }
  0xa9   : > { %4168 = vmatprep.mubr.msk.bf16.mxu0 %vm307_vm1, %v5066_v0  ;;  %4134 = vmatprep.mubr.msk.bf16.mxu1 %vm307_vm1, %v6067_v2 }
  0xb0   : > { %4169 = vmatmul.mubr.msk.bf16.gmra.mxu0 %vm307_vm1, %v5092_v61  ;;  %4135 = vmatmul.mubr.msk.bf16.gmra.mxu1 %vm307_vm1, %v6068_v34 }
  0xb1   : > { %4172 = vmatprep.mubr.msk.bf16.mxu0 %vm307_vm1, %v5116_v39  ;;  %4138 = vmatprep.mubr.msk.bf16.mxu1 %vm307_vm1, %v6069_v32 }
  0xb8   : > { %4173 = vmatmul.mubr.msk.bf16.gmra.mxu0 %vm307_vm1, %v5141_v29  ;;  %4139 = vmatmul.mubr.msk.bf16.gmra.mxu1 %vm307_vm1, %v6070_v48 }
  0xb9   : > { %4176 = vmatprep.mubr.msk.bf16.mxu0 %vm307_vm1, %v5157_v23  ;;  %4142 = vmatprep.mubr.msk.bf16.mxu1 %vm307_vm1, %v4746_v31 }
  0xc0   : > { %4177 = vmatmul.mubr.msk.bf16.gmra.mxu0 %vm307_vm1, %v5258_v27  ;;  %4143 = vmatmul.mubr.msk.bf16.gmra.mxu1 %vm307_vm1, %v3744_v18 }
  0xc1   : > { %4216 = vmatprep.mubr.msk.bf16.mxu0 %vm307_vm1, %v6059_v9  ;;  %4182 = vmatprep.mubr.msk.bf16.mxu1 %vm307_vm1, %v4770_v20 }
  0xc8   : > { %4217 = vmatmul.mubr.msk.bf16.vlgmr.msra.gmra.mxu0 %vm307_vm1, %v6060_v46  ;;  %4183 = vmatmul.mubr.msk.bf16.vlgmr.msra.gmra.mxu1 %vm307_vm1, %v4805_v55 }
  0xc9   : > { %4283 = vmatpush3.bf16.msra.mxu0 %v3204_v10  ;;  %4249 = vmatpush3.bf16.msra.mxu1 %v2928_v52 }
  0xca   : > { %4186 = vmatprep.mubr.msk.bf16.mxu1 %vm307_vm1, %v4831_v60  ;;  %4220 = vmatprep.mubr.msk.bf16.mxu0 %vm307_vm1, %v6061_v56 }
  0xd0   : > { %4221 = vmatmul.mubr.msk.bf16.gmra.mxu0 %vm307_vm1, %v6062_v40  ;;  %4187 = vmatmul.mubr.msk.bf16.gmra.mxu1 %vm307_vm1, %v4871_v58 }
  0xd1   : > { %4224 = vmatprep.mubr.msk.bf16.mxu0 %vm307_vm1, %v6063_v50  ;;  %4190 = vmatprep.mubr.msk.bf16.mxu1 %vm307_vm1, %v4901_v8 }
  0xd8   : > { %4225 = vmatmul.mubr.msk.bf16.gmra.mxu0 %vm307_vm1, %v4722_v43  ;;  %4191 = vmatmul.mubr.msk.bf16.gmra.mxu1 %vm307_vm1, %v4922_v3  ;;  %v4014_v20 = vpop.f32.mrf.mxu0 }
  0xd9   : > { %4228 = vmatprep.mubr.msk.bf16.mxu0 %vm307_vm1, %v6064_v12  ;;  %4194 = vmatprep.mubr.msk.bf16.mxu1 %vm307_vm1, %v4960_v44 }
  0xda   : > { %v5303_v43 = vpop.f32.mrf.mxu1  ;;  %v394_v21 = vpop.f32.mrf.mxu0 }
  0xdc   : > { %v5305_v11 = vpop.f32.mrf.mxu1  ;;  %v4015_v14 = vpop.f32.mrf.mxu0 }
  0xde   : > { %v5307_v9 = vpop.f32.mrf.mxu1  ;;  %v5309_v54 = vpop.f32.mrf.mxu0 }
  0xe0   : > { %4229 = vmatmul.mubr.msk.bf16.gmra.mxu0 %vm307_vm1, %v6065_v7  ;;  %4195 = vmatmul.mubr.msk.bf16.gmra.mxu1 %vm307_vm1, %v4981_v6  ;;  %v5315_v46 = vpop.f32.mrf.mxu1  ;;  %v5319_v56 = vpop.f32.mrf.mxu0 }
  0xe1   : > { %4232 = vmatprep.mubr.msk.bf16.mxu0 %vm307_vm1, %v6066_v45  ;;  %4198 = vmatprep.mubr.msk.bf16.mxu1 %vm307_vm1, %v5009_v42 }
  0xe2   : > { %v5323_v40 = vpop.f32.mrf.mxu1  ;;  %v5325_v50 = vpop.f32.mrf.mxu0 }
  0xe4   : > { %v5327_v12 = vpop.f32.mrf.mxu1  ;;  %v5329_v7 = vpop.f32.mrf.mxu0 }
  0xe6   : > { %v5331_v45 = vpop.f32.mrf.mxu1 }
  0xe8   : > { %4233 = vmatmul.mubr.msk.bf16.gmra.mxu0 %vm307_vm1, %v6067_v2  ;;  %4199 = vmatmul.mubr.msk.bf16.gmra.mxu1 %vm307_vm1, %v5035_v35  ;;  %v5333_v2 = vpop.f32.mrf.mxu0  ;;  %v5339_v51 = vpop.f32.mrf.mxu1 }
  0xe9   : > { %4236 = vmatprep.mubr.msk.bf16.mxu0 %vm307_vm1, %v6068_v34  ;;  %4202 = vmatprep.mubr.msk.bf16.mxu1 %vm307_vm1, %v5058_v15 }
  0xea   : > { %v5343_v4 = vpop.f32.mrf.mxu0  ;;  %v5347_v34 = vpop.f32.mrf.mxu1 }
  0xeb   : > { %6072 = vst [vmem:[#allocation6_spill] sm:$0xff] %v5347_v34 }
  0xec   : > { %v5349_v62 = vpop.f32.mrf.mxu0  ;;  %v5351_v5 = vpop.f32.mrf.mxu1 }
  0xed   : > { %6073 = vst [vmem:[#allocation8_spill] sm:$0xff] %v5351_v5 }
  0xee   : > { %v5353_v53 = vpop.f32.mrf.mxu0 }
  0xf0   : > { %4237 = vmatmul.mubr.msk.bf16.gmra.mxu0 %vm307_vm1, %v6069_v32  ;;  %4203 = vmatmul.mubr.msk.bf16.gmra.mxu1 %vm307_vm1, %v5084_v47  ;;  %v5355_v32 = vpop.f32.mrf.mxu1  ;;  %v5357_v38 = vpop.f32.mrf.mxu0 }
  0xf1   : > { %4240 = vmatprep.mubr.msk.bf16.mxu0 %vm307_vm1, %v6070_v48  ;;  %4206 = vmatprep.mubr.msk.bf16.mxu1 %vm307_vm1, %v5113_v17  ;;  %6074 = vst [vmem:[#allocation10_spill] sm:$0xff] %v5355_v32  ;;  %v5369_v48 = vld [vmem:[%s4421_s27 + $0xcc] sm:$0xf] }
  0xf2   : > { %v5363_v37 = vpop.f32.mrf.mxu1  ;;  %v5366_v22 = vpop.f32.mrf.mxu0 }
  0xf3   : > { %6075 = vst [vmem:[#allocation14_spill] sm:$0xff] %v5363_v37 }
  0xf4   : > { %v5376_v24 = vpop.f32.mrf.mxu1  ;;  %v5378_v10 = vpop.f32.mrf.mxu0 }
  0xf5   : > { %6076 = vst [vmem:[#allocation16_spill] sm:$0xff] %v5376_v24 }
  0xf6   : > { %v5382_v52 = vpop.f32.mrf.mxu1  ;;  %v5384_v37 = vpop.f32.mrf.mxu0 }
  0xf7   : > { %6077 = vst [vmem:[#allocation3_spill] sm:$0xff] %v5382_v52 }
  0xf8   : > { %4241 = vmatmul.mubr.msk.bf16.gmra.mxu0 %vm307_vm1, %v4746_v31  ;;  %4207 = vmatmul.mubr.msk.bf16.gmra.mxu1 %vm307_vm1, %v5138_v63  ;;  %v3799_v31 = vcombine.low %v5369_v48, %v5372_v16  ;;  %v5388_v32 = vpop.f32.mrf.mxu0 }
  0xf9   : > { %4244 = vmatprep.mubr.msk.bf16.mxu0 %vm307_vm1, %v3744_v18  ;;  %4210 = vmatprep.mubr.msk.bf16.mxu1 %vm307_vm1, %v5155_v57  ;;  %v5386_v18 = vpop.f32.mrf.mxu1 }
  0xfa   : > { %6078 = vst [vmem:[#allocation5_spill] sm:$0xff] %v5386_v18  ;;  %v4082_v24 = vpop.f32.mrf.mxu0 }
  0xfb   : > { %v5393_v13 = vpop.f32.mrf.mxu1 }
  0xfc   : > { %6079 = vst [vmem:[#allocation7_spill] sm:$0xff] %v5393_v13  ;;  %v1564_v27 = vpop.f32.mrf.mxu0 }
  0xfd   : > { %v4048_v52 = vpop.f32.mrf.mxu1 }
  0xfe   : > { %v1236_v5 = vadd.f32 %v4048_v52, %v4014_v20  ;;  %v4083_v41 = vpop.f32.mrf.mxu0 }
  0xff   : > { %v1075_v18 = vpop.f32.mrf.mxu1 }
 0x100   : > { %4245 = vmatmul.mubr.msk.bf16.gmra.mxu0 %vm307_vm1, %v3799_v31  ;;  %4211 = vmatmul.mubr.msk.bf16.gmra.mxu1 %vm307_vm1, %v5180_v36  ;;  %v5399_v23 = vadd.f32 %v4082_v24, %v1236_v5  ;;  %v1234_v31 = vadd.f32 %v1075_v18, %v394_v21  ;;  %v1567_v34 = vpop.f32.mrf.mxu0 }
 0x101   : > { %4284 = vmatprep.mubr.msk.bf16.mxu0 %vm307_vm1, %v4805_v55  ;;  %4250 = vmatprep.mubr.msk.bf16.mxu1 %vm307_vm1, %v4803_v49  ;;  %v4049_v57 = vpop.f32.mrf.mxu1 }
 0x102   : > { %v5403_v13 = vadd.f32 %v1564_v27, %v1234_v31  ;;  %v1237_v55 = vadd.f32 %v4049_v57, %v4015_v14  ;;  %v4086_v20 = vpop.f32.mrf.mxu0 }
 0x103   : > { %v1078_v49 = vpop.f32.mrf.mxu1 }
 0x104   : > { %v5409_v52 = vadd.f32 %v4083_v41, %v1237_v55  ;;  %v1235_v21 = vadd.f32 %v1078_v49, %v5309_v54 }
 0x105   : > { %v4052_v5 = vpop.f32.mrf.mxu1 }
 0x106   : > { %v5414_v27 = vadd.f32 %v1567_v34, %v1235_v21  ;;  %v1240_v57 = vadd.f32 %v4052_v5, %v5319_v56 }
 0x107   : > { %v1091_v14 = vpop.f32.mrf.mxu1 }
 0x108   : > { %4285 = vmatmul.mubr.msk.bf16.vlgmr.msra.gmra.mxu0 %vm307_vm1, %v4831_v60  ;;  %4251 = vmatmul.mubr.msk.bf16.vlgmr.msra.gmra.mxu1 %vm307_vm1, %v4841_v26  ;;  %v1580_v60 = vpop.f32.mrf.mxu0  ;;  %v5417_v24 = vadd.f32 %v4086_v20, %v1240_v57 }
 0x109   : > { %4288 = vmatprep.mubr.msk.bf16.mxu0 %vm307_vm1, %v4871_v58  ;;  %4254 = vmatprep.mubr.msk.bf16.mxu1 %vm307_vm1, %v4874_v1  ;;  %v1238_v58 = vadd.f32 %v1091_v14, %v5325_v50  ;;  %v4053_v18 = vpop.f32.mrf.mxu1 }
 0x10a   : > { %v4087_v26 = vpop.f32.mrf.mxu0  ;;  %v1241_v1 = vadd.f32 %v4053_v18, %v5329_v7 }
 0x10b   : > { %v5422_v54 = vadd.f32 %v1580_v60, %v1238_v58  ;;  %v1094_v34 = vpop.f32.mrf.mxu1 }
 0x10c   : > { %v1583_v41 = vpop.f32.mrf.mxu0  ;;  %v5429_v31 = vadd.f32 %v4087_v26, %v1241_v1  ;;  %v1239_v50 = vadd.f32 %v1094_v34, %v5333_v2 }
 0x10e   : > { %v4090_v56 = vpop.f32.mrf.mxu0  ;;  %v5434_v49 = vadd.f32 %v1583_v41, %v1239_v50 }
 0x110   : > { %4289 = vmatmul.mubr.msk.bf16.gmra.mxu0 %vm307_vm1, %v4901_v8  ;;  %4255 = vmatmul.mubr.msk.bf16.gmra.mxu1 %vm307_vm1, %v4904_v33  ;;  %v4056_v8 = vpop.f32.mrf.mxu1  ;;  %v1596_v55 = vpop.f32.mrf.mxu0 }
 0x111   : > { %4292 = vmatprep.mubr.msk.bf16.mxu0 %vm307_vm1, %v4922_v3  ;;  %4258 = vmatprep.mubr.msk.bf16.mxu1 %vm307_vm1, %v4933_v28  ;;  %v1244_v7 = vadd.f32 %v4056_v8, %v5343_v4 }
 0x112   : > { %v1107_v20 = vpop.f32.mrf.mxu1  ;;  %v4091_v33 = vpop.f32.mrf.mxu0 }
 0x113   : > { %v5437_v21 = vadd.f32 %v4090_v56, %v1244_v7  ;;  %v1242_v3 = vadd.f32 %v1107_v20, %v5349_v62 }
 0x114   : > { %v4057_v5 = vpop.f32.mrf.mxu1  ;;  %v1599_v60 = vpop.f32.mrf.mxu0 }
 0x115   : > { %v5442_v2 = vadd.f32 %v1596_v55, %v1242_v3  ;;  %v1245_v28 = vadd.f32 %v4057_v5, %v5353_v53  ;;  %v2896_v5 = vshrl.u32 %v5369_v48, 16 }
 0x116   : > { %v1110_v57 = vpop.f32.mrf.mxu1  ;;  %v4094_v4 = vpop.f32.mrf.mxu0 }
 0x117   : > { %v5449_v14 = vadd.f32 %v4091_v33, %v1245_v28  ;;  %v1243_v62 = vadd.f32 %v1110_v57, %v5357_v38 }
 0x118   : > { %4293 = vmatmul.mubr.msk.bf16.gmra.mxu0 %vm307_vm1, %v4960_v44  ;;  %4259 = vmatmul.mubr.msk.bf16.gmra.mxu1 %vm307_vm1, %v4971_v30  ;;  %v4060_v44 = vpop.f32.mrf.mxu1  ;;  %v1612_v26 = vpop.f32.mrf.mxu0 }
 0x119   : > { %4296 = vmatprep.mubr.msk.bf16.mxu0 %vm307_vm1, %v4981_v6  ;;  %4262 = vmatprep.mubr.msk.bf16.mxu1 %vm307_vm1, %v4979_v59  ;;  %v5454_v58 = vadd.f32 %v1599_v60, %v1243_v62  ;;  %v1248_v53 = vadd.f32 %v4060_v44, %v5366_v22  ;;  %v2899_v60 = vshll.u32 %v5369_v48, 16 }
 0x11a   : > { %v1123_v18 = vpop.f32.mrf.mxu1  ;;  %v4095_v30 = vpop.f32.mrf.mxu0 }
 0x11b   : > { %v5457_v41 = vadd.f32 %v4094_v4, %v1248_v53  ;;  %v1246_v6 = vadd.f32 %v1123_v18, %v5378_v10  ;;  %v2901_v62 = vrot.slane %v2899_v60, 5 }
 0x11c   : > { %v4061_v1 = vpop.f32.mrf.mxu1  ;;  %v1615_v34 = vpop.f32.mrf.mxu0 }
 0x11d   : > { %v5462_v38 = vadd.f32 %v1612_v26, %v1246_v6  ;;  %v1249_v59 = vadd.f32 %v4061_v1, %v5384_v37  ;;  %v225_v1 = vld [vmem:[%s4421_s27 + $0xd4] sm:$0x1] }
 0x11e   : > { %v1126_v56 = vpop.f32.mrf.mxu1  ;;  %v4098_v22 = vpop.f32.mrf.mxu0 }
 0x11f   : > { %v5469_v50 = vadd.f32 %v4095_v30, %v1249_v59  ;;  %v1247_v10 = vadd.f32 %v1126_v56, %v5388_v32 }
 0x120   : > { %4297 = vmatmul.mubr.msk.bf16.gmra.mxu0 %vm307_vm1, %v5009_v42  ;;  %4263 = vmatmul.mubr.msk.bf16.gmra.mxu1 %vm307_vm1, %v5012_v25  ;;  %v4064_v42 = vpop.f32.mrf.mxu1  ;;  %v1628_v8 = vpop.f32.mrf.mxu0 }
 0x121   : > { %4300 = vmatprep.mubr.msk.bf16.mxu0 %vm307_vm1, %v5035_v35  ;;  %4266 = vmatprep.mubr.msk.bf16.mxu1 %vm307_vm1, %v5038_v19  ;;  %v5474_v55 = vadd.f32 %v1615_v34, %v1247_v10  ;;  %v1252_v37 = vadd.f32 %v4064_v42, %v5303_v43 }
 0x122   : > { %v1139_v7 = vpop.f32.mrf.mxu1  ;;  %v4099_v25 = vpop.f32.mrf.mxu0 }
 0x123   : > { %v5477_v20 = vadd.f32 %v4098_v22, %v1252_v37  ;;  %v1250_v35 = vadd.f32 %v1139_v7, %v5305_v11  ;;  %v2905_v11 = vshll.u32 %v5372_v16, 16 }
 0x124   : > { %v4065_v33 = vpop.f32.mrf.mxu1  ;;  %v1631_v3 = vpop.f32.mrf.mxu0 }
 0x125   : > { %v5482_v32 = vadd.f32 %v1628_v8, %v1250_v35  ;;  %v1253_v19 = vadd.f32 %v4065_v33, %v5307_v9  ;;  %v3834_v8 = vrot.slane %v5369_v48, 9  ;;  %v6092_v48 = vld [vmem:[#allocation7_spill] sm:$0xff] }
 0x126   : > { %v1142_v43 = vpop.f32.mrf.mxu1 }
 0x127   : > { %v5493_v28 = vadd.f32 %v4099_v25, %v1253_v19  ;;  %v1251_v9 = vadd.f32 %v1142_v43, %v5315_v46  ;;  %v4102_v57 = vpop.f32.mrf.mxu0  ;;  %v3190_v46 = vrot.slane %v5372_v16, 5  ;;  %v6080_v19 = vld [vmem:[#allocation6_spill] sm:$0xff]  ;;  %v6082_v43 = vld [vmem:[#allocation19_spill] sm:$0xff] }
 0x128   : > { %4301 = vmatmul.mubr.msk.bf16.gmra.mxu0 %vm307_vm1, %v5058_v15  ;;  %4267 = vmatmul.mubr.msk.bf16.gmra.mxu1 %vm307_vm1, %v5066_v0  ;;  %v2909_v15 = vshrl.u32 %v5372_v16, 16  ;;  %v2898_v0 = vrot.slane %v2896_v5, 4  ;;  %v6081_v5 = vld [vmem:[#allocation18_spill] sm:$0xff] }
 0x129   : > { %4304 = vmatprep.mubr.msk.bf16.mxu0 %vm307_vm1, %v5084_v47  ;;  %4270 = vmatprep.mubr.msk.bf16.mxu1 %vm307_vm1, %v5092_v61  ;;  %v5498_v4 = vadd.f32 %v1631_v3, %v1251_v9  ;;  %v1644_v26 = vpop.f32.mrf.mxu0  ;;  %v2907_v47 = vrot.slane %v2905_v11, 5  ;;  %v3192_v37 = vrot.slane %v3190_v46, 4  ;;  %v3191_v11 = vsel %vm4637_vm7, %v3834_v8, %v3190_v46 }
 0x12a   : > { %v4068_v44 = vpop.f32.mrf.mxu1  ;;  %v2911_v53 = vrot.slane %v2909_v15, 4 }
 0x12b   : > { %v1256_v18 = vadd.f32 %v4068_v44, %v5323_v40  ;;  %v4103_v6 = vpop.f32.mrf.mxu0  ;;  %v2902_v40 = vor.u32 %v2901_v62, %v2898_v0  ;;  %v6085_v44 = vld [vmem:[#allocation4_spill] sm:$0xff] }
 0x12c   : > { %v1155_v30 = vpop.f32.mrf.mxu1 }
 0x12d   : > { %v5502_v34 = vadd.f32 %v4102_v57, %v1256_v18  ;;  %v1254_v61 = vadd.f32 %v1155_v30, %v5327_v12  ;;  %v1647_v10 = vpop.f32.mrf.mxu0  ;;  %v2915_v12 = vshll.u32 %v225_v1, 16  ;;  %v2903_v35 = vrot.slane %v2902_v40, 4  ;;  %v6084_v57 = vld [vmem:[#allocation8_spill] sm:$0xff] }
 0x12e   : > { %v4069_v59 = vpop.f32.mrf.mxu1 }
 0x12f   : > { %v5512_v56 = vadd.f32 %v1644_v26, %v1254_v61  ;;  %v1257_v22 = vadd.f32 %v4069_v59, %v5331_v45  ;;  %v2917_v33 = vrot.slane %v2915_v12, 5 }
 0x130   : > { %4305 = vmatmul.mubr.msk.bf16.gmra.mxu0 %vm307_vm1, %v5113_v17  ;;  %4271 = vmatmul.mubr.msk.bf16.gmra.mxu1 %vm307_vm1, %v5116_v39  ;;  %v2912_v17 = vor.u32 %v2911_v53, %v2907_v47  ;;  %v1158_v42 = vpop.f32.mrf.mxu1  ;;  %v2908_v53 = vsel %vm4610_vm6, %v2903_v35, %v2907_v47  ;;  %v6090_v35 = vld [vmem:[#allocation3_spill] sm:$0xff] }
 0x131   : > { %4308 = vmatprep.mubr.msk.bf16.mxu0 %vm307_vm1, %v5138_v63  ;;  %4274 = vmatprep.mubr.msk.bf16.mxu1 %vm307_vm1, %v5141_v29  ;;  %v5517_v16 = vadd.f32 %v4103_v6, %v1257_v22  ;;  %v1255_v39 = vadd.f32 %v1158_v42, %v5339_v51  ;;  %v3193_v63 = vrot.slane %v225_v1, 5  ;;  %v6087_v6 = vld [vmem:[#allocation10_spill] sm:$0xff] }
 0x132   : > { %v2913_v45 = vrot.slane %v2912_v17, 4 }
 0x133   : > { %v5521_v7 = vadd.f32 %v1647_v10, %v1255_v39  ;;  %v3194_v15 = vsel %vm4637_vm7, %v3192_v37, %v3193_v63  ;;  %v6088_v10 = vld [vmem:[#allocation14_spill] sm:$0xff]  ;;  %v6089_v39 = vld [vmem:[#allocation16_spill] sm:$0xff] }
 0x134   : > { %v4106_v25 = vpop.f32.mrf.mxu0  ;;  %v3836_v46 = vcombine.low %v3191_v11, %v3194_v15 }
 0x135   : > { %v4072_v3 = vpop.f32.mrf.mxu1 }
 0x136   : > { %v1260_v29 = vadd.f32 %v4072_v3, %v6080_v19  ;;  %v1660_v60 = vpop.f32.mrf.mxu0 }
 0x137   : > { %v1171_v51 = vpop.f32.mrf.mxu1 }
 0x138   : > { %4309 = vmatmul.mubr.msk.bf16.gmra.mxu0 %vm307_vm1, %v6081_v5  ;;  %4275 = vmatmul.mubr.msk.bf16.gmra.mxu1 %vm307_vm1, %v6082_v43  ;;  %v5534_v9 = vadd.f32 %v4106_v25, %v1260_v29  ;;  %v1258_v0 = vadd.f32 %v1171_v51, %v6084_v57  ;;  %v4107_v62 = vpop.f32.mrf.mxu0  ;;  %v6091_v29 = vld [vmem:[#allocation5_spill] sm:$0xff] }
 0x139   : > { %4312 = vmatprep.mubr.msk.bf16.mxu0 %vm307_vm1, %v5180_v36  ;;  %4278 = vmatprep.mubr.msk.bf16.mxu1 %vm307_vm1, %v6085_v44  ;;  %v2918_v36 = vsel %vm4610_vm6, %v2913_v45, %v2917_v33  ;;  %v4073_v18 = vpop.f32.mrf.mxu1 }
 0x13a   : > { %v5543_v30 = vadd.f32 %v1660_v60, %v1258_v0  ;;  %v1261_v1 = vadd.f32 %v4073_v18, %v6087_v6  ;;  %v1663_v61 = vpop.f32.mrf.mxu0  ;;  %v3817_v40 = vcombine.low %v2908_v53, %v2918_v36 }
 0x13b   : > { %v1174_v59 = vpop.f32.mrf.mxu1 }
 0x13c   : > { %v5546_v22 = vadd.f32 %v4107_v62, %v1261_v1  ;;  %v1259_v17 = vadd.f32 %v1174_v59, %v6088_v10 }
 0x13e   : > { %v5549_v12 = vadd.f32 %v1663_v61, %v1259_v17 }
 0x140   : > { %v4110_v42 = vpop.f32.mrf.mxu0  ;;  %4313 = vmatmul.mubr.msk.bf16.gmra.mxu0 %vm307_vm1, %v3836_v46  ;;  %v4076_v47 = vpop.f32.mrf.mxu1  ;;  %4279 = vmatmul.mubr.msk.bf16.gmra.mxu1 %vm307_vm1, %v3817_v40 }
 0x141   : > { %v1264_v8 = vadd.f32 %v4076_v47, %v6089_v39 }
 0x142   : > { %v1676_v37 = vpop.f32.mrf.mxu0  ;;  %v1187_v63 = vpop.f32.mrf.mxu1 }
 0x143   : > { %v5554_v25 = vadd.f32 %v4110_v42, %v1264_v8  ;;  %v1262_v45 = vadd.f32 %v1187_v63, %v6090_v35 }
 0x144   : > { %v4111_v33 = vpop.f32.mrf.mxu0  ;;  %v4077_v3 = vpop.f32.mrf.mxu1 }
 0x145   : > { %v5557_v19 = vadd.f32 %v1676_v37, %v1262_v45  ;;  %v1265_v5 = vadd.f32 %v4077_v3, %v6091_v29 }
 0x146   : > { %v1679_v60 = vpop.f32.mrf.mxu0  ;;  %v1190_v43 = vpop.f32.mrf.mxu1 }
 0x147   : > { %v5560_v51 = vadd.f32 %v4111_v33, %v1265_v5  ;;  %v1263_v11 = vadd.f32 %v1190_v43, %v6092_v48 }
 0x148   : > { %v4150_v15 = vpop.f32.mrf.mxu0  ;;  %v4116_v57 = vpop.f32.mrf.mxu1 }
 0x149   : > { %v5563_v0 = vadd.f32 %v1679_v60, %v1263_v11  ;;  %v1995_v62 = vadd.f32 %v4116_v57, %v5399_v23 }
 0x14a   : > { %v2126_v44 = vpop.f32.mrf.mxu0  ;;  %v1834_v26 = vpop.f32.mrf.mxu1 }
 0x14b   : > { %v5566_v53 = vadd.f32 %v4150_v15, %v1995_v62  ;;  %v1993_v36 = vadd.f32 %v1834_v26, %v5403_v13 }
 0x14c   : > { %v4151_v18 = vpop.f32.mrf.mxu0  ;;  %v4117_v6 = vpop.f32.mrf.mxu1 }
 0x14d   : > { %v5569_v1 = vadd.f32 %v2126_v44, %v1993_v36  ;;  %v1996_v61 = vadd.f32 %v4117_v6, %v5409_v52 }
 0x14e   : > { %v2129_v46 = vpop.f32.mrf.mxu0  ;;  %v1837_v59 = vpop.f32.mrf.mxu1 }
 0x14f   : > { %v5572_v40 = vadd.f32 %v4151_v18, %v1996_v61  ;;  %v1994_v10 = vadd.f32 %v1837_v59, %v5414_v27 }
 0x150   : > { %v4154_v17 = vpop.f32.mrf.mxu0  ;;  %v4120_v23 = vpop.f32.mrf.mxu1 }
 0x151   : > { %v5575_v42 = vadd.f32 %v2129_v46, %v1994_v10  ;;  %v1999_v47 = vadd.f32 %v4120_v23, %v5417_v24 }
 0x152   : > { %v2142_v39 = vpop.f32.mrf.mxu0  ;;  %v1850_v13 = vpop.f32.mrf.mxu1 }
 0x153   : > { %v5578_v8 = vadd.f32 %v4154_v17, %v1999_v47  ;;  %v1997_v37 = vadd.f32 %v1850_v13, %v5422_v54 }
 0x154   : > { %v4155_v63 = vpop.f32.mrf.mxu0  ;;  %v4121_v52 = vpop.f32.mrf.mxu1 }
 0x155   : > { %v5581_v35 = vadd.f32 %v2142_v39, %v1997_v37  ;;  %v2000_v45 = vadd.f32 %v4121_v52, %v5429_v31 }
 0x156   : > { %v2145_v33 = vpop.f32.mrf.mxu0  ;;  %v1853_v27 = vpop.f32.mrf.mxu1 }
 0x157   : > { %v5584_v3 = vadd.f32 %v4155_v63, %v2000_v45  ;;  %v1998_v29 = vadd.f32 %v1853_v27, %v5434_v49 }
 0x158   : > { %v4158_v5 = vpop.f32.mrf.mxu0  ;;  %v4124_v24 = vpop.f32.mrf.mxu1 }
 0x159   : > { %v5587_v60 = vadd.f32 %v2145_v33, %v1998_v29  ;;  %v2003_v43 = vadd.f32 %v4124_v24, %v5437_v21 }
 0x15a   : > { %v2158_v48 = vpop.f32.mrf.mxu0  ;;  %v1866_v54 = vpop.f32.mrf.mxu1 }
 0x15b   : > { %v5590_v11 = vadd.f32 %v4158_v5, %v2003_v43  ;;  %v2001_v15 = vadd.f32 %v1866_v54, %v5442_v2 }
 0x15c   : > { %v4159_v57 = vpop.f32.mrf.mxu0  ;;  %v4125_v31 = vpop.f32.mrf.mxu1 }
 0x15d   : > { %v5593_v62 = vadd.f32 %v2158_v48, %v2001_v15  ;;  %v2004_v44 = vadd.f32 %v4125_v31, %v5449_v14 }
 0x15e   : > { %v2161_v26 = vpop.f32.mrf.mxu0  ;;  %v1869_v49 = vpop.f32.mrf.mxu1 }
 0x15f   : > { %v5596_v36 = vadd.f32 %v4159_v57, %v2004_v44  ;;  %v2002_v18 = vadd.f32 %v1869_v49, %v5454_v58 }
 0x160   : > { %v4162_v6 = vpop.f32.mrf.mxu0  ;;  %v4128_v21 = vpop.f32.mrf.mxu1 }
 0x161   : > { %v5599_v61 = vadd.f32 %v2161_v26, %v2002_v18  ;;  %v2007_v46 = vadd.f32 %v4128_v21, %v5457_v41 }
 0x162   : > { %v2174_v59 = vpop.f32.mrf.mxu0  ;;  %v1882_v2 = vpop.f32.mrf.mxu1 }
 0x163   : > { %v5602_v10 = vadd.f32 %v4162_v6, %v2007_v46  ;;  %v2005_v17 = vadd.f32 %v1882_v2, %v5462_v38 }
 0x164   : > { %v4163_v23 = vpop.f32.mrf.mxu0  ;;  %v4129_v14 = vpop.f32.mrf.mxu1 }
 0x165   : > { %v5605_v47 = vadd.f32 %v2174_v59, %v2005_v17  ;;  %v2008_v39 = vadd.f32 %v4129_v14, %v5469_v50 }
 0x166   : > { %v2177_v13 = vpop.f32.mrf.mxu0  ;;  %v1885_v58 = vpop.f32.mrf.mxu1 }
 0x167   : > { %v5608_v37 = vadd.f32 %v4163_v23, %v2008_v39  ;;  %v2006_v63 = vadd.f32 %v1885_v58, %v5474_v55 }
 0x168   : > { %v4166_v52 = vpop.f32.mrf.mxu0  ;;  %v4132_v41 = vpop.f32.mrf.mxu1 }
 0x169   : > { %v5611_v45 = vadd.f32 %v2177_v13, %v2006_v63  ;;  %v2011_v33 = vadd.f32 %v4132_v41, %v5477_v20 }
 0x16a   : > { %v2190_v27 = vpop.f32.mrf.mxu0  ;;  %v1898_v38 = vpop.f32.mrf.mxu1 }
 0x16b   : > { %v5614_v29 = vadd.f32 %v4166_v52, %v2011_v33  ;;  %v2009_v5 = vadd.f32 %v1898_v38, %v5482_v32 }
 0x16c   : > { %v4167_v24 = vpop.f32.mrf.mxu0  ;;  %v4133_v50 = vpop.f32.mrf.mxu1 }
 0x16d   : > { %v5617_v43 = vadd.f32 %v2190_v27, %v2009_v5  ;;  %v2012_v48 = vadd.f32 %v4133_v50, %v5493_v28 }
 0x16e   : > { %v2193_v54 = vpop.f32.mrf.mxu0  ;;  %v1901_v55 = vpop.f32.mrf.mxu1 }
 0x16f   : > { %v5620_v15 = vadd.f32 %v4167_v24, %v2012_v48  ;;  %v2010_v57 = vadd.f32 %v1901_v55, %v5498_v4 }
 0x170   : > { %v4170_v31 = vpop.f32.mrf.mxu0  ;;  %v4136_v20 = vpop.f32.mrf.mxu1 }
 0x171   : > { %6093 = vst [vmem:[#allocation9_spill] sm:$0xff] %v5620_v15  ;;  %v5623_v44 = vadd.f32 %v2193_v54, %v2010_v57  ;;  %v2015_v26 = vadd.f32 %v4136_v20, %v5502_v34 }
 0x172   : > { %v2206_v49 = vpop.f32.mrf.mxu0  ;;  %v1914_v32 = vpop.f32.mrf.mxu1 }
 0x173   : > { %6094 = vst [vmem:[#allocation12_spill] sm:$0xff] %v5623_v44  ;;  %v5626_v18 = vadd.f32 %v4170_v31, %v2015_v26  ;;  %v2013_v6 = vadd.f32 %v1914_v32, %v5512_v56 }
 0x174   : > { %v4171_v21 = vpop.f32.mrf.mxu0  ;;  %v4137_v28 = vpop.f32.mrf.mxu1 }
 0x175   : > { %6095 = vst [vmem:[#allocation15_spill] sm:$0xff] %v5626_v18  ;;  %v5629_v46 = vadd.f32 %v2206_v49, %v2013_v6  ;;  %v2016_v59 = vadd.f32 %v4137_v28, %v5517_v16 }
 0x176   : > { %v2209_v2 = vpop.f32.mrf.mxu0  ;;  %v1917_v4 = vpop.f32.mrf.mxu1 }
 0x177   : > { %6096 = vst [vmem:[#allocation17_spill] sm:$0xff] %v5629_v46  ;;  %v5632_v17 = vadd.f32 %v4171_v21, %v2016_v59  ;;  %v2014_v23 = vadd.f32 %v1917_v4, %v5521_v7 }
 0x178   : > { %v4174_v14 = vpop.f32.mrf.mxu0  ;;  %v4140_v34 = vpop.f32.mrf.mxu1 }
 0x179   : > { %6097 = vst [vmem:[#allocation6_spill] sm:$0xff] %v5632_v17  ;;  %v5635_v39 = vadd.f32 %v2209_v2, %v2014_v23  ;;  %v2019_v13 = vadd.f32 %v4140_v34, %v5534_v9 }
 0x17a   : > { %v2222_v58 = vpop.f32.mrf.mxu0  ;;  %v1930_v56 = vpop.f32.mrf.mxu1 }
 0x17b   : > { %6098 = vst [vmem:[#allocation18_spill] sm:$0xff] %v5635_v39  ;;  %v5638_v63 = vadd.f32 %v4174_v14, %v2019_v13  ;;  %v2017_v52 = vadd.f32 %v1930_v56, %v5543_v30 }
 0x17c   : > { %v4175_v41 = vpop.f32.mrf.mxu0  ;;  %v4141_v16 = vpop.f32.mrf.mxu1 }
 0x17d   : > { %6099 = vst [vmem:[#allocation19_spill] sm:$0xff] %v5638_v63  ;;  %v5641_v33 = vadd.f32 %v2222_v58, %v2017_v52  ;;  %v2020_v27 = vadd.f32 %v4141_v16, %v5546_v22 }
 0x17e   : > { %v2225_v38 = vpop.f32.mrf.mxu0  ;;  %v1933_v7 = vpop.f32.mrf.mxu1 }
 0x17f   : > { %6100 = vst [vmem:[#allocation13_spill] sm:$0xff] %v5641_v33  ;;  %v5644_v5 = vadd.f32 %v4175_v41, %v2020_v27  ;;  %v2018_v24 = vadd.f32 %v1933_v7, %v5549_v12 }
 0x180   : > { %v4178_v50 = vpop.f32.mrf.mxu0  ;;  %v4144_v9 = vpop.f32.mrf.mxu1 }
 0x181   : > { %6101 = vst [vmem:[#allocation8_spill] sm:$0xff] %v5644_v5  ;;  %v5647_v48 = vadd.f32 %v2225_v38, %v2018_v24  ;;  %v2023_v54 = vadd.f32 %v4144_v9, %v5554_v25 }
 0x182   : > { %v2238_v55 = vpop.f32.mrf.mxu0  ;;  %v1946_v30 = vpop.f32.mrf.mxu1 }
 0x183   : > { %6102 = vst [vmem:[#allocation4_spill] sm:$0xff] %v5647_v48  ;;  %v5650_v57 = vadd.f32 %v4178_v50, %v2023_v54  ;;  %v2021_v31 = vadd.f32 %v1946_v30, %v5557_v19 }
 0x184   : > { %v4179_v20 = vpop.f32.mrf.mxu0  ;;  %v4145_v22 = vpop.f32.mrf.mxu1 }
 0x185   : > { %6103 = vst [vmem:[#allocation11_spill] sm:$0xff] %v5650_v57  ;;  %v5653_v26 = vadd.f32 %v2238_v55, %v2021_v31  ;;  %v2024_v49 = vadd.f32 %v4145_v22, %v5560_v51 }
 0x186   : > { %v2241_v32 = vpop.f32.mrf.mxu0  ;;  %v1949_v12 = vpop.f32.mrf.mxu1 }
 0x187   : > { %6104 = vst [vmem:[#allocation10_spill] sm:$0xff] %v5653_v26  ;;  %v5656_v6 = vadd.f32 %v4179_v20, %v2024_v49  ;;  %v2022_v21 = vadd.f32 %v1949_v12, %v5563_v0 }
 0x188   : > { %v5659_v28 = vpop.f32.mrf.mxu0  ;;  %v4184_v25 = vpop.f32.mrf.mxu1 }
 0x189   : > { %6105 = vst [vmem:[#allocation14_spill] sm:$0xff] %v5656_v6  ;;  %v5661_v59 = vadd.f32 %v2241_v32, %v2022_v21 }
 0x18a   : > { %v5663_v2 = vpop.f32.mrf.mxu0  ;;  %v2402_v19 = vpop.f32.mrf.mxu1 }
 0x18b   : > { %6106 = vst [vmem:[#allocation16_spill] sm:$0xff] %v5661_v59 }
 0x18c   : > { %v5665_v4 = vpop.f32.mrf.mxu0  ;;  %v4185_v23 = vpop.f32.mrf.mxu1 }
 0x18e   : > { %v5667_v14 = vpop.f32.mrf.mxu0  ;;  %v5669_v51 = vpop.f32.mrf.mxu1 }
 0x190   : > { %v5671_v34 = vpop.f32.mrf.mxu0  ;;  %v5673_v13 = vpop.f32.mrf.mxu1 }
 0x192   : > { %v5675_v0 = vpop.f32.mrf.mxu0  ;;  %v5677_v58 = vpop.f32.mrf.mxu1 }
 0x194   : > { %v5679_v56 = vpop.f32.mrf.mxu0  ;;  %v5681_v52 = vpop.f32.mrf.mxu1 }
 0x196   : > { %v5683_v41 = vpop.f32.mrf.mxu0  ;;  %v5685_v16 = vpop.f32.mrf.mxu1 }
 0x198   : > { %v5687_v27 = vpop.f32.mrf.mxu0  ;;  %v5689_v38 = vpop.f32.mrf.mxu1 }
 0x19a   : > { %v5691_v7 = vpop.f32.mrf.mxu0  ;;  %v5693_v24 = vpop.f32.mrf.mxu1 }
 0x19c   : > { %v5695_v50 = vpop.f32.mrf.mxu0  ;;  %v5697_v9 = vpop.f32.mrf.mxu1 }
 0x19e   : > { %v5699_v54 = vpop.f32.mrf.mxu0  ;;  %v5701_v55 = vpop.f32.mrf.mxu1 }
 0x1a0   : > { %v5703_v30 = vpop.f32.mrf.mxu0  ;;  %v5705_v31 = vpop.f32.mrf.mxu1 }
 0x1a2   : > { %v5707_v20 = vpop.f32.mrf.mxu0  ;;  %v5709_v22 = vpop.f32.mrf.mxu1 }
 0x1a4   : > { %v5711_v49 = vpop.f32.mrf.mxu0  ;;  %v5713_v32 = vpop.f32.mrf.mxu1 }
 0x1a6   : > { %v5715_v12 = vpop.f32.mrf.mxu0  ;;  %v5717_v21 = vpop.f32.mrf.mxu1 }
 0x1a8   : > { %v5719_v59 = vpop.f32.mrf.mxu0  ;;  %v5721_v6 = vpop.f32.mrf.mxu1 }
 0x1aa   : > { %v5723_v26 = vpop.f32.mrf.mxu0  ;;  %v5725_v57 = vpop.f32.mrf.mxu1 }
 0x1ab   : > { %6107 = vst [vmem:[#allocation3_spill] sm:$0xff] %v5723_v26 }
 0x1ac   : > { %v5727_v48 = vpop.f32.mrf.mxu0  ;;  %v5729_v5 = vpop.f32.mrf.mxu1 }
 0x1ad   : > { %6108 = vst [vmem:[#allocation5_spill] sm:$0xff] %v5727_v48  ;;  %6109 = vst [vmem:[#allocation7_spill] sm:$0xff] %v5729_v5 }
 0x1ae   : > { %v5731_v33 = vpop.f32.mrf.mxu0  ;;  %v5733_v63 = vpop.f32.mrf.mxu1 }
 0x1af   : > { %6110 = vst [vmem:[#allocation20_spill] sm:$0xff] %v5731_v33  ;;  %6111 = vst [vmem:[#allocation21_spill] sm:$0xff] %v5733_v63 }
 0x1b0   : > { %v5735_v39 = vpop.f32.mrf.mxu0  ;;  %v5737_v17 = vpop.f32.mrf.mxu1 }
 0x1b1   : > { %6112 = vst [vmem:[#allocation22_spill] sm:$0xff] %v5735_v39  ;;  %6113 = vst [vmem:[#allocation23_spill] sm:$0xff] %v5737_v17 }
 0x1b2   : > { %v5739_v46 = vpop.f32.mrf.mxu0  ;;  %v5741_v18 = vpop.f32.mrf.mxu1 }
 0x1b3   : > { %6114 = vst [vmem:[#allocation24_spill] sm:$0xff] %v5739_v46  ;;  %6115 = vst [vmem:[#allocation25_spill] sm:$0xff] %v5741_v18 }
 0x1b4   : > { %v5743_v44 = vpop.f32.mrf.mxu0  ;;  %v5745_v26 = vpop.f32.mrf.mxu1 }
 0x1b5   : > { %6116 = vst [vmem:[#allocation26_spill] sm:$0xff] %v5743_v44  ;;  %6117 = vst [vmem:[#allocation27_spill] sm:$0xff] %v5745_v26 }
 0x1b6   : > { %v5747_v15 = vpop.f32.mrf.mxu0  ;;  %v5749_v48 = vpop.f32.mrf.mxu1 }
 0x1b7   : > { %6118 = vst [vmem:[#allocation28_spill] sm:$0xff] %v5747_v15  ;;  %6119 = vst [vmem:[#allocation29_spill] sm:$0xff] %v5749_v48 }
 0x1b8   : > { %v5751_v5 = vpop.f32.mrf.mxu0  ;;  %v5753_v33 = vpop.f32.mrf.mxu1 }
 0x1b9   : > { %6120 = vst [vmem:[#allocation30_spill] sm:$0xff] %v5751_v5  ;;  %6121 = vst [vmem:[#allocation31_spill] sm:$0xff] %v5753_v33 }
 0x1ba   : > { %v5755_v63 = vpop.f32.mrf.mxu0  ;;  %v5757_v39 = vpop.f32.mrf.mxu1 }
 0x1bb   : > { %6122 = vst [vmem:[#allocation32_spill] sm:$0xff] %v5755_v63  ;;  %6123 = vst [vmem:[#allocation33_spill] sm:$0xff] %v5757_v39  ;;  %v2563_v63 = vadd.f32 %v4184_v25, %v5566_v53  ;;  %v2562_v53 = vadd.f32 %v5669_v51, %v5575_v42  ;;  %v2565_v42 = vadd.f32 %v5677_v58, %v5581_v35 }
 0x1bc   : > { %v5759_v17 = vpop.f32.mrf.mxu0  ;;  %v5761_v46 = vpop.f32.mrf.mxu1  ;;  %v2568_v35 = vadd.f32 %v5681_v52, %v5584_v3  ;;  %v2571_v52 = vadd.f32 %v5689_v38, %v5590_v11 }
 0x1bd   : > { %6124 = vst [vmem:[#allocation34_spill] sm:$0xff] %v5759_v17  ;;  %6125 = vst [vmem:[#allocation35_spill] sm:$0xff] %v5761_v46  ;;  %v2561_v46 = vadd.f32 %v2402_v19, %v5569_v1  ;;  %v2567_v1 = vadd.f32 %v5673_v13, %v5578_v8  ;;  %v5796_v19 = vld [vmem:[%s5956_s2] ss:$0 sm:$0xff] }
 0x1be   : > { %v5763_v18 = vpop.f32.mrf.mxu0  ;;  %v5765_v44 = vpop.f32.mrf.mxu1 }
 0x1bf   : > { %6126 = vst [vmem:[#allocation36_spill] sm:$0xff] %v5763_v18  ;;  %6127 = vst [vmem:[#allocation37_spill] sm:$0xff] %v5765_v44 }
 0x1c0   : > { %v5767_v26 = vpop.f32.mrf.mxu0  ;;  %v5769_v15 = vpop.f32.mrf.mxu1 }
 0x1c1   : > { %6128 = vst [vmem:[#allocation38_spill] sm:$0xff] %v5767_v26  ;;  %6129 = vst [vmem:[#allocation39_spill] sm:$0xff] %v5769_v15  ;;  %v2833_v26 = vadd.f32 %v5659_v28, %v2563_v63  ;;  %v2564_v15 = vadd.f32 %v4185_v23, %v5572_v40 }
 0x1c2   : > { %v5771_v5 = vpop.f32.mrf.mxu0  ;;  %v5773_v33 = vpop.f32.mrf.mxu1 }
 0x1c3   : > { %6130 = vst [vmem:[#allocation40_spill] sm:$0xff] %v5771_v5  ;;  %6131 = vst [vmem:[#allocation41_spill] sm:$0xff] %v5773_v33  ;;  %v2831_v33 = vadd.f32 %v5663_v2, %v2561_v46  ;;  %v2834_v40 = vadd.f32 %v5665_v4, %v2564_v15 }
 0x1c4   : > { %v5776_v39 = vpop.f32.mrf.mxu0  ;;  %v5778_v17 = vpop.f32.mrf.mxu1 }
 0x1c5   : > { %6132 = vst [vmem:[#allocation42_spill] sm:$0xff] %v5776_v39 }
 0x1c6   : > { %v5781_v18 = vpop.f32.mrf.mxu0  ;;  %v5783_v44 = vpop.f32.mrf.mxu1 }
 0x1c8   : > { %v4286_v48 = vpop.f32.mrf.mxu0  ;;  %v4252_v5 = vpop.f32.mrf.mxu1 }
 0x1c9   : > { %v3125_v25 = vadd.f32 %v4252_v5, %v2833_v26  ;;  %v2832_v5 = vadd.f32 %v5667_v14, %v2562_v53  ;;  %v2835_v14 = vadd.f32 %v5675_v0, %v2565_v42 }
 0x1ca   : > { %v3240_v39 = vpop.f32.mrf.mxu0  ;;  %v2964_v63 = vpop.f32.mrf.mxu1 }
 0x1cb   : > { %v3401_v28 = vadd.f32 %v4286_v48, %v3125_v25  ;;  %v3123_v23 = vadd.f32 %v2964_v63, %v2831_v33  ;;  %v2837_v33 = vadd.f32 %v5671_v34, %v2567_v1 }
 0x1cc   : > { %v4287_v46 = vpop.f32.mrf.mxu0  ;;  %v4253_v8 = vpop.f32.mrf.mxu1 }
 0x1cd   : > { %v3504_v26 = vadd.f32 %v5796_v19, %v3401_v28  ;;  %v3399_v2 = vadd.f32 %v3240_v39, %v3123_v23  ;;  %v3126_v15 = vadd.f32 %v4253_v8, %v2834_v40  ;;  %v2566_v39 = vadd.f32 %v5685_v16, %v5587_v60 }
 0x1ce   : > { %v3243_v48 = vpop.f32.mrf.mxu0  ;;  %v2967_v4 = vpop.f32.mrf.mxu1  ;;  %v2838_v28 = vadd.f32 %v5679_v56, %v2568_v35  ;;  %v2569_v16 = vadd.f32 %v5693_v24, %v5593_v62  ;;  %v2570_v35 = vadd.f32 %v5701_v55, %v5599_v61  ;;  %v2573_v55 = vadd.f32 %v5709_v22, %v5605_v47 }
 0x1cf   : > { %3536 = vst [vmem:[%s5804_s15 + $0x10] sm:$0xff] %v3504_v26  ;;  %v3502_v51 = vadd.f32 %v5796_v19, %v3399_v2  ;;  %v3402_v13 = vadd.f32 %v4287_v46, %v3126_v15  ;;  %v3124_v58 = vadd.f32 %v2967_v4, %v2832_v5  ;;  %v2836_v8 = vadd.f32 %v5683_v41, %v2566_v39 }
 0x1d0   : > { %v4290_v25 = vpop.f32.mrf.mxu0  ;;  %v4256_v53 = vpop.f32.mrf.mxu1  ;;  %v2841_v26 = vadd.f32 %v5687_v27, %v2571_v52  ;;  %v2572_v15 = vadd.f32 %v5697_v9, %v5596_v36  ;;  %v2575_v9 = vadd.f32 %v5705_v31, %v5602_v10  ;;  %v2576_v52 = vadd.f32 %v5713_v32, %v5608_v37 }
 0x1d1   : > { %3534 = vst [vmem:[%s5804_s15] sm:$0xff] %v3502_v51  ;;  %v3505_v34 = vadd.f32 %v5796_v19, %v3402_v13  ;;  %v3400_v1 = vadd.f32 %v3243_v48, %v3124_v58  ;;  %v3129_v63 = vadd.f32 %v4256_v53, %v2837_v33  ;;  %v2839_v33 = vadd.f32 %v5691_v7, %v2569_v16 }
 0x1d2   : > { %v3256_v3 = vpop.f32.mrf.mxu0  ;;  %v2980_v40 = vpop.f32.mrf.mxu1  ;;  %v2579_v32 = vadd.f32 %v5721_v6, %v5614_v29 }
 0x1d3   : > { %3537 = vst [vmem:[%s5804_s15 + $0x18] sm:$0xff] %v3505_v34  ;;  %v3503_v0 = vadd.f32 %v5796_v19, %v3400_v1  ;;  %v3405_v23 = vadd.f32 %v4290_v25, %v3129_v63  ;;  %v3127_v46 = vadd.f32 %v2980_v40, %v2835_v14  ;;  %v2842_v25 = vadd.f32 %v5695_v50, %v2572_v15  ;;  %v6133_v15 = vld [vmem:[#allocation9_spill] sm:$0xff] }
 0x1d4   : > { %v4291_v60 = vpop.f32.mrf.mxu0  ;;  %v4257_v42 = vpop.f32.mrf.mxu1  ;;  %v2840_v34 = vadd.f32 %v5699_v54, %v2570_v35  ;;  %v2845_v63 = vadd.f32 %v5703_v30, %v2575_v9  ;;  %v6136_v35 = vld [vmem:[#allocation12_spill] sm:$0xff] }
 0x1d5   : > { %3535 = vst [vmem:[%s5804_s15 + $0x8] sm:$0xff] %v3503_v0  ;;  %v3508_v11 = vadd.f32 %v5796_v19, %v3405_v23  ;;  %v3403_v38 = vadd.f32 %v3256_v3, %v3127_v46  ;;  %v3130_v5 = vadd.f32 %v4257_v42, %v2838_v28  ;;  %v2843_v28 = vadd.f32 %v5707_v20, %v2573_v55 }
 0x1d6   : > { %v3259_v56 = vpop.f32.mrf.mxu0  ;;  %v2983_v2 = vpop.f32.mrf.mxu1  ;;  %v2574_v23 = vadd.f32 %v5717_v21, %v5611_v45  ;;  %v2846_v42 = vadd.f32 %v5711_v49, %v2576_v52  ;;  %v2577_v21 = vadd.f32 %v5725_v57, %v5617_v43 }
 0x1d7   : > { %3540 = vst [vmem:[%s5804_s15 + $0x30] sm:$0xff] %v3508_v11  ;;  %v3506_v62 = vadd.f32 %v5796_v19, %v3403_v38  ;;  %v3406_v24 = vadd.f32 %v4291_v60, %v3130_v5  ;;  %v3128_v48 = vadd.f32 %v2983_v2, %v2836_v8 }
 0x1d8   : > { %v4294_v41 = vpop.f32.mrf.mxu0  ;;  %v4260_v4 = vpop.f32.mrf.mxu1  ;;  %v2844_v5 = vadd.f32 %v5715_v12, %v2574_v23 }
 0x1d9   : > { %3538 = vst [vmem:[%s5804_s15 + $0x20] sm:$0xff] %v3506_v62  ;;  %v3509_v27 = vadd.f32 %v5796_v19, %v3406_v24  ;;  %v3404_v51 = vadd.f32 %v3259_v56, %v3128_v48  ;;  %v3133_v13 = vadd.f32 %v4260_v4, %v2841_v26  ;;  %v2849_v26 = vadd.f32 %v5719_v59, %v2579_v32  ;;  %v6134_v62 = vld [vmem:[#allocation7_spill] sm:$0xff] }
 0x1da   : > { %v3272_v36 = vpop.f32.mrf.mxu0  ;;  %v2996_v58 = vpop.f32.mrf.mxu1  ;;  %v2580_v24 = vadd.f32 %v6134_v62, %v6133_v15  ;;  %v6152_v62 = vld [vmem:[#allocation26_spill] sm:$0xff] }
 0x1db   : > { %3541 = vst [vmem:[%s5804_s15 + $0x38] sm:$0xff] %v3509_v27  ;;  %v3507_v7 = vadd.f32 %v5796_v19, %v3404_v51  ;;  %v3409_v14 = vadd.f32 %v4294_v41, %v3133_v13  ;;  %v3131_v53 = vadd.f32 %v2996_v58, %v2839_v33  ;;  %v6135_v41 = vld [vmem:[#allocation3_spill] sm:$0xff]  ;;  %v6137_v27 = vld [vmem:[#allocation21_spill] sm:$0xff] }
 0x1dc   : > { %v4295_v61 = vpop.f32.mrf.mxu0  ;;  %v4261_v39 = vpop.f32.mrf.mxu1  ;;  %v2847_v33 = vadd.f32 %v6135_v41, %v2577_v21  ;;  %v2578_v51 = vadd.f32 %v6137_v27, %v6136_v35  ;;  %v6138_v58 = vld [vmem:[#allocation15_spill] sm:$0xff]  ;;  %v6149_v21 = vld [vmem:[#allocation29_spill] sm:$0xff]  ;;  %v6155_v27 = vld [vmem:[#allocation28_spill] sm:$0xff] }
 0x1dd   : > { %3539 = vst [vmem:[%s5804_s15 + $0x28] sm:$0xff] %v3507_v7  ;;  %v3512_v10 = vadd.f32 %v5796_v19, %v3409_v14  ;;  %v3407_v31 = vadd.f32 %v3272_v36, %v3131_v53  ;;  %v3134_v1 = vadd.f32 %v4261_v39, %v2842_v25  ;;  %v6139_v25 = vld [vmem:[#allocation23_spill] sm:$0xff]  ;;  %v6140_v53 = vld [vmem:[#allocation5_spill] sm:$0xff] }
 0x1de   : > { %v3275_v50 = vpop.f32.mrf.mxu0  ;;  %v2999_v3 = vpop.f32.mrf.mxu1  ;;  %v2583_v7 = vadd.f32 %v6139_v25, %v6138_v58  ;;  %v6153_v41 = vld [vmem:[#allocation13_spill] sm:$0xff]  ;;  %v6156_v58 = vld [vmem:[#allocation30_spill] sm:$0xff] }
 0x1df   : > { %3544 = vst [vmem:[%s5804_s15 + $0x50] sm:$0xff] %v3512_v10  ;;  %v3510_v47 = vadd.f32 %v5796_v19, %v3407_v31  ;;  %v3410_v22 = vadd.f32 %v4295_v61, %v3134_v1  ;;  %v3132_v40 = vadd.f32 %v2999_v3, %v2840_v34  ;;  %v2850_v61 = vadd.f32 %v6140_v53, %v2580_v24  ;;  %v6141_v31 = vld [vmem:[#allocation17_spill] sm:$0xff]  ;;  %v6143_v3 = vld [vmem:[#allocation20_spill] sm:$0xff]  ;;  %v6158_v53 = vld [vmem:[#allocation35_spill] sm:$0xff] }
 0x1e0   : > { %v4298_v54 = vpop.f32.mrf.mxu0  ;;  %v4264_v0 = vpop.f32.mrf.mxu1  ;;  %v6142_v1 = vld [vmem:[#allocation25_spill] sm:$0xff]  ;;  %v2848_v52 = vadd.f32 %v6143_v3, %v2578_v51 }
 0x1e1   : > { %3542 = vst [vmem:[%s5804_s15 + $0x40] sm:$0xff] %v3510_v47  ;;  %v3513_v30 = vadd.f32 %v5796_v19, %v3410_v22  ;;  %v3408_v46 = vadd.f32 %v3275_v50, %v3132_v40  ;;  %v3137_v60 = vadd.f32 %v4264_v0, %v2845_v63  ;;  %v2581_v50 = vadd.f32 %v6142_v1, %v6141_v31  ;;  %v6159_v31 = vld [vmem:[#allocation32_spill] sm:$0xff]  ;;  %v6161_v3 = vld [vmem:[#allocation37_spill] sm:$0xff] }
 0x1e2   : > { %v3288_v37 = vpop.f32.mrf.mxu0  ;;  %v3012_v16 = vpop.f32.mrf.mxu1 }
 0x1e3   : > { %3545 = vst [vmem:[%s5804_s15 + $0x58] sm:$0xff] %v3513_v30  ;;  %v3511_v20 = vadd.f32 %v5796_v19, %v3408_v46  ;;  %v3413_v8 = vadd.f32 %v4298_v54, %v3137_v60  ;;  %v3135_v11 = vadd.f32 %v3012_v16, %v2843_v28  ;;  %v6144_v28 = vld [vmem:[#allocation22_spill] sm:$0xff]  ;;  %v6146_v46 = vld [vmem:[#allocation27_spill] sm:$0xff] }
 0x1e4   : > { %v4299_v45 = vpop.f32.mrf.mxu0  ;;  %v4265_v38 = vpop.f32.mrf.mxu1  ;;  %v2853_v0 = vadd.f32 %v6144_v28, %v2583_v7  ;;  %v6145_v30 = vld [vmem:[#allocation6_spill] sm:$0xff]  ;;  %v6162_v28 = vld [vmem:[#allocation11_spill] sm:$0xff] }
 0x1e5   : > { %3543 = vst [vmem:[%s5804_s15 + $0x48] sm:$0xff] %v3511_v20  ;;  %v3516_v29 = vadd.f32 %v5796_v19, %v3413_v8  ;;  %v3411_v6 = vadd.f32 %v3288_v37, %v3135_v11  ;;  %v3138_v56 = vadd.f32 %v4265_v38, %v2846_v42  ;;  %v2584_v60 = vadd.f32 %v6146_v46, %v6145_v30  ;;  %v6147_v20 = vld [vmem:[#allocation24_spill] sm:$0xff]  ;;  %v6164_v46 = vld [vmem:[#allocation34_spill] sm:$0xff] }
 0x1e6   : > { %v3291_v49 = vpop.f32.mrf.mxu0  ;;  %v3015_v2 = vpop.f32.mrf.mxu1  ;;  %v2851_v8 = vadd.f32 %v6147_v20, %v2581_v50  ;;  %v6165_v20 = vld [vmem:[#allocation10_spill] sm:$0xff] }
 0x1e7   : > { %3548 = vst [vmem:[%s5804_s15 + $0x70] sm:$0xff] %v3516_v29  ;;  %v3514_v43 = vadd.f32 %v5796_v19, %v3411_v6  ;;  %v3414_v57 = vadd.f32 %v4299_v45, %v3138_v56  ;;  %v3136_v48 = vadd.f32 %v3015_v2, %v2844_v5  ;;  %v6148_v45 = vld [vmem:[#allocation18_spill] sm:$0xff]  ;;  %v2854_v24 = vadd.f32 %v6152_v62, %v2584_v60 }
 0x1e8   : > { %v4302_v12 = vpop.f32.mrf.mxu0  ;;  %v4268_v4 = vpop.f32.mrf.mxu1  ;;  %v2582_v38 = vadd.f32 %v6149_v21, %v6148_v45  ;;  %v6167_v21 = vld [vmem:[#allocation36_spill] sm:$0xff] }
 0x1e9   : > { %3546 = vst [vmem:[%s5804_s15 + $0x60] sm:$0xff] %v3514_v43  ;;  %v3517_v59 = vadd.f32 %v5796_v19, %v3414_v57  ;;  %v3412_v13 = vadd.f32 %v3291_v49, %v3136_v48  ;;  %v3141_v36 = vadd.f32 %v4268_v4, %v2849_v26  ;;  %v6150_v49 = vld [vmem:[#allocation19_spill] sm:$0xff] }
 0x1ea   : > { %v3304_v9 = vpop.f32.mrf.mxu0  ;;  %v3028_v14 = vpop.f32.mrf.mxu1  ;;  %v6151_v26 = vld [vmem:[#allocation31_spill] sm:$0xff]  ;;  %v2852_v51 = vadd.f32 %v6155_v27, %v2582_v38 }
 0x1eb   : > { %3549 = vst [vmem:[%s5804_s15 + $0x78] sm:$0xff] %v3517_v59  ;;  %v3515_v55 = vadd.f32 %v5796_v19, %v3412_v13  ;;  %v3417_v39 = vadd.f32 %v4302_v12, %v3141_v36  ;;  %v3139_v34 = vadd.f32 %v3028_v14, %v2847_v33  ;;  %v2587_v2 = vadd.f32 %v6151_v26, %v6150_v49  ;;  %v6154_v33 = vld [vmem:[#allocation33_spill] sm:$0xff]  ;;  %v6157_v14 = vld [vmem:[#allocation8_spill] sm:$0xff]  ;;  %v6168_v49 = vld [vmem:[#allocation38_spill] sm:$0xff] }
 0x1ec   : > { %v4303_v10 = vpop.f32.mrf.mxu0  ;;  %v4269_v63 = vpop.f32.mrf.mxu1  ;;  %v2585_v4 = vadd.f32 %v6154_v33, %v6153_v41 }
 0x1ed   : > { %3547 = vst [vmem:[%s5804_s15 + $0x68] sm:$0xff] %v3515_v55  ;;  %v3520_v47 = vadd.f32 %v5796_v19, %v3417_v39  ;;  %v3415_v22 = vadd.f32 %v3304_v9, %v3139_v34  ;;  %v3142_v40 = vadd.f32 %v4269_v63, %v2850_v61  ;;  %v2857_v25 = vadd.f32 %v6156_v58, %v2587_v2  ;;  %v6160_v63 = vld [vmem:[#allocation4_spill] sm:$0xff] }
 0x1ee   : > { %v3307_v54 = vpop.f32.mrf.mxu0  ;;  %v3031_v23 = vpop.f32.mrf.mxu1  ;;  %v2588_v61 = vadd.f32 %v6158_v53, %v6157_v14  ;;  %v2855_v1 = vadd.f32 %v6159_v31, %v2585_v4  ;;  %v6171_v4 = vld [vmem:[#allocation16_spill] sm:$0xff] }
 0x1ef   : > { %3552 = vst [vmem:[%s5804_s15 + $0x90] sm:$0xff] %v3520_v47  ;;  %v3518_v37 = vadd.f32 %v5796_v19, %v3415_v22  ;;  %v3418_v32 = vadd.f32 %v4303_v10, %v3142_v40  ;;  %v3140_v16 = vadd.f32 %v3031_v23, %v2848_v52  ;;  %v2586_v52 = vadd.f32 %v6161_v3, %v6160_v63 }
 0x1f0   : > { %v4306_v42 = vpop.f32.mrf.mxu0  ;;  %v4272_v11 = vpop.f32.mrf.mxu1  ;;  %v2858_v60 = vadd.f32 %v6164_v46, %v2588_v61 }
 0x1f1   : > { %3550 = vst [vmem:[%s5804_s15 + $0x80] sm:$0xff] %v3518_v37  ;;  %v3521_v5 = vadd.f32 %v5796_v19, %v3418_v32  ;;  %v3416_v29 = vadd.f32 %v3307_v54, %v3140_v16  ;;  %v3145_v6 = vadd.f32 %v4272_v11, %v2853_v0  ;;  %v6163_v0 = vld [vmem:[#allocation39_spill] sm:$0xff]  ;;  %v2856_v38 = vadd.f32 %v6167_v21, %v2586_v52 }
 0x1f2   : > { %v3320_v56 = vpop.f32.mrf.mxu0  ;;  %v3044_v15 = vpop.f32.mrf.mxu1  ;;  %v2591_v23 = vadd.f32 %v6163_v0, %v6162_v28 }
 0x1f3   : > { %3553 = vst [vmem:[%s5804_s15 + $0x98] sm:$0xff] %v3521_v5  ;;  %v3519_v43 = vadd.f32 %v5796_v19, %v3416_v29  ;;  %v3421_v57 = vadd.f32 %v4306_v42, %v3145_v6  ;;  %v3143_v48 = vadd.f32 %v3044_v15, %v2851_v8  ;;  %v6166_v8 = vld [vmem:[#allocation41_spill] sm:$0xff]  ;;  %v6169_v15 = vld [vmem:[#allocation14_spill] sm:$0xff] }
 0x1f4   : > { %v4307_v12 = vpop.f32.mrf.mxu0  ;;  %v4273_v35 = vpop.f32.mrf.mxu1  ;;  %v2589_v11 = vadd.f32 %v6166_v8, %v6165_v20  ;;  %v2861_v26 = vadd.f32 %v6168_v49, %v2591_v23  ;;  %v2592_v62 = vadd.f32 %v5778_v17, %v6169_v15 }
 0x1f5   : > { %3551 = vst [vmem:[%s5804_s15 + $0x88] sm:$0xff] %v3519_v43  ;;  %v3524_v59 = vadd.f32 %v5796_v19, %v3421_v57  ;;  %v3419_v13 = vadd.f32 %v3320_v56, %v3143_v48  ;;  %v3146_v36 = vadd.f32 %v4273_v35, %v2854_v24  ;;  %v2590_v35 = vadd.f32 %v5783_v44, %v6171_v4 }
 0x1f6   : > { %v3323_v9 = vpop.f32.mrf.mxu0  ;;  %v3047_v7 = vpop.f32.mrf.mxu1 }
 0x1f7   : > { %3556 = vst [vmem:[%s5804_s15 + $0xb0] sm:$0xff] %v3524_v59  ;;  %v3522_v55 = vadd.f32 %v5796_v19, %v3419_v13  ;;  %v3422_v39 = vadd.f32 %v4307_v12, %v3146_v36  ;;  %v3144_v34 = vadd.f32 %v3047_v7, %v2852_v51  ;;  %v6170_v12 = vld [vmem:[#allocation40_spill] sm:$0xff]  ;;  %v6172_v36 = vld [vmem:[#allocation42_spill] sm:$0xff]  ;;  %v2860_v44 = vadd.f32 %v5781_v18, %v2590_v35 }
 0x1f8   : > { %v4310_v10 = vpop.f32.mrf.mxu0  ;;  %v4276_v50 = vpop.f32.mrf.mxu1  ;;  %v2859_v41 = vadd.f32 %v6170_v12, %v2589_v11 }
 0x1f9   : > { %3554 = vst [vmem:[%s5804_s15 + $0xa0] sm:$0xff] %v3522_v55  ;;  %v3525_v47 = vadd.f32 %v5796_v19, %v3422_v39  ;;  %v3420_v22 = vadd.f32 %v3323_v9, %v3144_v34  ;;  %v3149_v40 = vadd.f32 %v4276_v50, %v2857_v25  ;;  %v2862_v9 = vadd.f32 %v6172_v36, %v2592_v62 }
 0x1fa   : > { %v3336_v54 = vpop.f32.mrf.mxu0  ;;  %v3060_v30 = vpop.f32.mrf.mxu1 }
 0x1fb   : > { %3557 = vst [vmem:[%s5804_s15 + $0xb8] sm:$0xff] %v3525_v47  ;;  %v3523_v37 = vadd.f32 %v5796_v19, %v3420_v22  ;;  %v3425_v32 = vadd.f32 %v4310_v10, %v3149_v40  ;;  %v3147_v16 = vadd.f32 %v3060_v30, %v2855_v1 }
 0x1fc   : > { %v4311_v42 = vpop.f32.mrf.mxu0  ;;  %v4277_v45 = vpop.f32.mrf.mxu1 }
 0x1fd   : > { %3555 = vst [vmem:[%s5804_s15 + $0xa8] sm:$0xff] %v3523_v37  ;;  %v3528_v5 = vadd.f32 %v5796_v19, %v3425_v32  ;;  %v3423_v29 = vadd.f32 %v3336_v54, %v3147_v16  ;;  %v3150_v6 = vadd.f32 %v4277_v45, %v2858_v60 }
 0x1fe   : > { %v3339_v56 = vpop.f32.mrf.mxu0  ;;  %v3063_v2 = vpop.f32.mrf.mxu1 }
 0x1ff   : > { %3560 = vst [vmem:[%s5804_s15 + $0xd0] sm:$0xff] %v3528_v5  ;;  %v3526_v24 = vadd.f32 %v5796_v19, %v3423_v29  ;;  %v3426_v43 = vadd.f32 %v4311_v42, %v3150_v6  ;;  %v3148_v57 = vadd.f32 %v3063_v2, %v2856_v38 }
 0x200   : > { %v4314_v48 = vpop.f32.mrf.mxu0  ;;  %v4280_v33 = vpop.f32.mrf.mxu1 }
 0x201   : > { %3558 = vst [vmem:[%s5804_s15 + $0xc0] sm:$0xff] %v3526_v24  ;;  %v3529_v27 = vadd.f32 %v5796_v19, %v3426_v43  ;;  %v3424_v51 = vadd.f32 %v3339_v56, %v3148_v57  ;;  %v3153_v59 = vadd.f32 %v4280_v33, %v2861_v26 }
 0x202   : > { %v3352_v17 = vpop.f32.mrf.mxu0  ;;  %v3076_v13 = vpop.f32.mrf.mxu1 }
 0x203   : > { %3561 = vst [vmem:[%s5804_s15 + $0xd8] sm:$0xff] %v3529_v27  ;;  %v3527_v58 = vadd.f32 %v5796_v19, %v3424_v51  ;;  %v3429_v25 = vadd.f32 %v4314_v48, %v3153_v59  ;;  %v3151_v7 = vadd.f32 %v3076_v13, %v2859_v41 }
 0x204   : > { %v4281_v14 = vpop.f32.mrf.mxu1  ;;  %v4315_v53 = vpop.f32.mrf.mxu0 }
 0x205   : > { %3559 = vst [vmem:[%s5804_s15 + $0xc8] sm:$0xff] %v3527_v58  ;;  %v3532_v61 = vadd.f32 %v5796_v19, %v3429_v25  ;;  %v3427_v55 = vadd.f32 %v3352_v17, %v3151_v7  ;;  %v3154_v39 = vadd.f32 %v4281_v14, %v2862_v9 }
 0x206   : > { %v3079_v34 = vpop.f32.mrf.mxu1  ;;  %v3355_v50 = vpop.f32.mrf.mxu0 }
 0x207   : > { %3564 = vst [vmem:[%s5804_s15 + $0xf0] sm:$0xff] %v3532_v61  ;;  %v3530_v10 = vadd.f32 %v5796_v19, %v3427_v55  ;;  %v3430_v31 = vadd.f32 %v4315_v53, %v3154_v39  ;;  %v3152_v1 = vadd.f32 %v3079_v34, %v2860_v44 }
 0x209   : > { %3562 = vst [vmem:[%s5804_s15 + $0xe0] sm:$0xff] %v3530_v10  ;;  %v3533_v63 = vadd.f32 %v5796_v19, %v3430_v31  ;;  %v3428_v3 = vadd.f32 %v3355_v50, %v3152_v1 }
 0x20b   : > { %3565 = vst [vmem:[%s5804_s15 + $0xf8] sm:$0xff] %v3533_v63  ;;  %v3531_v18 = vadd.f32 %v5796_v19, %v3428_v3 }
 0x20d   : > { %3563 = vst [vmem:[%s5804_s15 + $0xe8] sm:$0xff] %v3531_v18 }
 0x20e PF: > { %s13_s12 = sadd.s32 1, %s4361_s12  }
 0x20f   : > { %p10_p4 = scmp.ge.s32.totalorder %s13_s12, 4  }
 0x211   :  { %12 = sbr.rel (!%p10_p4) target bundleno = 1 (0x1), region = 70 }

</bundles_post_ra>
